<compile_context>
chip_gen: v7x
topology: tpu7x:2x2x1
jax: 0.10.0
libtpu: 0.0.40
codegen_flags: <defaults>
</compile_context>

<pallas_src>
import functools

import jax
import jax.numpy as jnp
from jax.experimental import pallas as pl
from jax.experimental.pallas import tpu as pltpu


def _self_attention_kernel(x_ref, wqkv_ref, bqkv_ref, wo_ref, bo_ref, o_ref,
                           *, batch, seq, n_heads, head_dim):
    """Single-step kernel: full problem resident in VMEM.

    x_ref    : (B, S, E)   activations (f32)
    wqkv_ref : (E, 3E)     fused [Wq^T*scale | Wk^T | Wv^T]  (bf16)
    bqkv_ref : (1, 3E)     fused [bq*scale | bk | bv]        (f32)
    wo_ref   : (E, E)      Wo^T                              (bf16)
    bo_ref   : (1, E)      bo                                 (f32)
    o_ref    : (B, S, E)   output (f32)
    """
    B, S, H, D = batch, seq, n_heads, head_dim
    E = H * D

    # (B, S, E) -> (B*S, E): leading-dim merge, no relayout.  bf16 for the MXU.
    xf = x_ref[...].reshape(B * S, E).astype(jnp.bfloat16)

    # One fused QKV projection instead of three small MXU launches.  The 1/sqrt(D)
    # scale is already folded into the Q third of the weights/bias (prepare_params).
    qkv = jnp.dot(xf, wqkv_ref[...], preferred_element_type=jnp.float32) + bqkv_ref[...]
    qkv = qkv.astype(jnp.bfloat16)                      # (B*S, 3E)

    q = qkv[:, 0 * E:1 * E]                             # (B*S, E), scale pre-folded
    k = qkv[:, 1 * E:2 * E]
    v = qkv[:, 2 * E:3 * E]

    # Attention, statically unrolled over the tiny batch (B is a Python int, so this
    # is pure instruction duplication — no grid/loop overhead).  Heads are batched in
    # a single leading batch dim ('hqd,hkd->hqk'), the batched dot_general form that
    # Mosaic lowers natively.
    ctx_rows = []
    for b in range(B):
        lo, hi = b * S, (b + 1) * S
        qb = q[lo:hi].reshape(S, H, D).swapaxes(0, 1)   # (H, S, D)
        kb = k[lo:hi].reshape(S, H, D).swapaxes(0, 1)   # (H, S, D)
        vb = v[lo:hi].reshape(S, H, D).swapaxes(0, 1)   # (H, S, D)

        scores = jnp.einsum("hqd,hkd->hqk", qb, kb,
                            preferred_element_type=jnp.float32)      # (H, S, S) f32

        # Numerically-safe softmax, full f32 (exact reciprocal on the EUP).
        m = jnp.max(scores, axis=-1, keepdims=True)
        e = jnp.exp(scores - m)
        denom = jnp.sum(e, axis=-1, keepdims=True)
        attn = (e * pl.reciprocal(denom, approx=False)).astype(jnp.bfloat16)

        ctx = jnp.einsum("hqk,hkd->hqd", attn, vb,
                         preferred_element_type=jnp.float32)         # (H, S, D)
        ctx_rows.append(ctx.swapaxes(0, 1).reshape(S, E))            # (S, E)

    ctx_all = jnp.concatenate(ctx_rows, axis=0).astype(jnp.bfloat16)  # (B*S, E)

    # Single fused output projection over all B*S rows.
    out = jnp.dot(ctx_all, wo_ref[...], preferred_element_type=jnp.float32) + bo_ref[...]
    o_ref[...] = out.reshape(B, S, E).astype(o_ref.dtype)
    # TODO(synk): for large S/E, switch to a KV-tiled online-softmax (flash) form and
    # K/N-tile the weights — the resident weights + materialized (H,S,S) scores hit
    # v7x's 64 MiB physical VMEM well before v5e/v6e's 128 MiB.
    # TODO(synk): a lane-dense (B, S*E) output view would avoid masked 32-of-128-lane
    # stores, but at 2 KiB of output it only pays if the MLIR shows no compensating
    # relayout — benchmark before enabling.


def prepare_params(params, *, n_heads):
    """One-time, out-of-forward-path parameter prep (nn.Linear -> kernel layout).

    - transpose to (in, out) so the kernel never transposes on-chip,
    - fuse Wq/Wk/Wv into one (E, 3E) operand (single QKV matmul),
    - fold the 1/sqrt(head_dim) attention scale into Wq / bq,
    - store weights in bf16 (half the weight DMA; matmuls accumulate in f32).
    """
    E = params["wq"].shape[1]
    D = E // n_heads
    assert D * n_heads == E, "embed_dim must be divisible by n_attention_heads"
    scale = 1.0 / (D ** 0.5)

    w_qkv = jnp.concatenate(
        [params["wq"].T * scale, params["wk"].T, params["wv"].T], axis=1)   # (E, 3E)
    b_qkv = jnp.concatenate(
        [params["bq"] * scale, params["bk"], params["bv"]]).reshape(1, 3 * E)
    w_o = params["wo"].T                                                    # (E, E)
    b_o = params["bo"].reshape(1, E)

    return dict(
        w_qkv=w_qkv.astype(jnp.bfloat16),
        b_qkv=b_qkv.astype(jnp.float32),
        w_o=w_o.astype(jnp.bfloat16),
        b_o=b_o.astype(jnp.float32),
        n_heads=n_heads, head_dim=D, embed_dim=E,
    )


def self_attention(x, prepped):
    """x: (B, S, E) f32; prepped: output of prepare_params()."""
    B, S, E = x.shape
    H, D = prepped["n_heads"], prepped["head_dim"]
    assert E == prepped["embed_dim"] and E == H * D, "embed_dim mismatch with params"
    assert prepped["w_qkv"].shape == (E, 3 * E) and prepped["w_o"].shape == (E, E)

    kernel = functools.partial(_self_attention_kernel,
                               batch=B, seq=S, n_heads=H, head_dim=D)

    return pl.pallas_call(
        kernel,
        out_shape=jax.ShapeDtypeStruct((B, S, E), x.dtype),
        # Single grid step: one TensorCore does the whole (tiny) problem; no per-step
        # pipeline overhead.  All blocks equal the full array dims, so the (8,128)
        # tiling rule does not apply.
        grid=(1,),
        in_specs=[
            pl.BlockSpec((B, S, E), lambda i: (0, 0, 0)),      # x
            pl.BlockSpec((E, 3 * E), lambda i: (0, 0)),        # fused QKV weight (bf16)
            pl.BlockSpec((1, 3 * E), lambda i: (0, 0)),        # fused QKV bias (f32)
            pl.BlockSpec((E, E), lambda i: (0, 0)),            # Wo^T (bf16)
            pl.BlockSpec((1, E), lambda i: (0, 0)),            # bo (f32)
        ],
        out_specs=pl.BlockSpec((B, S, E), lambda i: (0, 0, 0)),
        compiler_params=pltpu.CompilerParams(
            dimension_semantics=("arbitrary",),
            # Trivially fits today (weights are ~8 KiB in bf16); revisit together with
            # the flash/K-N-tiling TODO before scaling E/S (v7x physical VMEM = 64 MiB).
            vmem_limit_bytes=32 * 1024 * 1024,
        ),
    )(x, prepped["w_qkv"], prepped["b_qkv"], prepped["w_o"], prepped["b_o"])


def self_attention_reference(x, params, *, n_heads):
    """Pure-JAX f32 reference mirroring the PyTorch forward exactly."""
    B, S, E = x.shape
    D = E // n_heads
    q = x @ params["wq"].T + params["bq"]
    k = x @ params["wk"].T + params["bk"]
    v = x @ params["wv"].T + params["bv"]
    q = q.reshape(B, S, n_heads, D).transpose(0, 2, 1, 3)
    k = k.reshape(B, S, n_heads, D).transpose(0, 2, 1, 3)
    v = v.reshape(B, S, n_heads, D).transpose(0, 2, 1, 3)
    scores = jnp.einsum("bhqd,bhkd->bhqk", q, k) / (D ** 0.5)
    attn = jax.nn.softmax(scores, axis=-1)
    out = jnp.einsum("bhqk,bhkd->bhqd", attn, v)
    out = out.transpose(0, 2, 1, 3).reshape(B, S, E)
    return out @ params["wo"].T + params["bo"]


def init_params(key, embed_dim):
    """Deterministic init matching nn.Linear shapes: W (out, in), b (out,)."""
    ks = jax.random.split(key, 8)
    scale = 1.0 / (embed_dim ** 0.5)

    def lin(kw, kb):
        w = jax.random.uniform(kw, (embed_dim, embed_dim), jnp.float32, -scale, scale)
        b = jax.random.uniform(kb, (embed_dim,), jnp.float32, -scale, scale)
        return w, b

    wq, bq = lin(ks[0], ks[1])
    wk, bk = lin(ks[2], ks[3])
    wv, bv = lin(ks[4], ks[5])
    wo, bo = lin(ks[6], ks[7])
    return dict(wq=wq, bq=bq, wk=wk, bk=bk, wv=wv, bv=bv, wo=wo, bo=bo)


if __name__ == "__main__":
    B, S, E, H = 2, 8, 32, 4   # embed_dim=32, n_attention_heads=4 -> head_dim=8
    key = jax.random.PRNGKey(0)
    kx, kp = jax.random.split(key)
    x = jax.random.normal(kx, (B, S, E), jnp.float32)
    params = init_params(kp, E)

    # One-time parameter prep (kept out of the forward path).
    prepped = prepare_params(params, n_heads=H)

    out = self_attention(x, prepped)
    out = jax.block_until_ready(out)

    ref = self_attention_reference(x, params, n_heads=H)
    assert out.shape == (B, S, E)
    # Tolerance reflects bf16 MXU operands (weights/activations rounded to bf16 with
    # f32 accumulation); softmax itself is exact f32 now (approx=False reciprocal).
    err = jnp.max(jnp.abs(out - ref))
    assert jnp.allclose(out, ref, atol=2e-2, rtol=2e-2), f"max abs diff {err}"
    print("KERNEL_OK")
</pallas_src>

<mosaic_0001>
module attributes {stable_mosaic.version = 11 : i64} {
  func.func @_self_attention_kernel(%arg0: i32, %arg1: memref<2x8x32xf32, #tpu.memory_space<vmem>>, %arg2: memref<32x96xbf16, #tpu.memory_space<vmem>>, %arg3: memref<1x96xf32, #tpu.memory_space<vmem>>, %arg4: memref<32x32xbf16, #tpu.memory_space<vmem>>, %arg5: memref<1x32xf32, #tpu.memory_space<vmem>>, %arg6: memref<2x8x32xf32, #tpu.memory_space<vmem>>) attributes {dimension_semantics = [#tpu.dimension_semantics<arbitrary>], iteration_bounds = array<i64: 1>, scalar_prefetch = 0 : i64, scratch_operands = 0 : i64, tpu.core_type = #tpu.core_type<tc>, window_params = [{pipeline_mode = #tpu.pipeline_mode<synchronous>, transform_indices = @transform_0, window_bounds = array<i64: 2, 8, 32>}, {pipeline_mode = #tpu.pipeline_mode<synchronous>, transform_indices = @transform_1, window_bounds = array<i64: 32, 96>}, {pipeline_mode = #tpu.pipeline_mode<synchronous>, transform_indices = @transform_2, window_bounds = array<i64: 1, 96>}, {pipeline_mode = #tpu.pipeline_mode<synchronous>, transform_indices = @transform_3, window_bounds = array<i64: 32, 32>}, {pipeline_mode = #tpu.pipeline_mode<synchronous>, transform_indices = @transform_4, window_bounds = array<i64: 1, 32>}, {pipeline_mode = #tpu.pipeline_mode<synchronous>, transform_indices = @transform_5, window_bounds = array<i64: 2, 8, 32>}]} {
    %c0 = arith.constant 0 : index
    %c0_0 = arith.constant 0 : index
    %c0_1 = arith.constant 0 : index
    %0 = vector.load %arg1[%c0, %c0_0, %c0_1] : memref<2x8x32xf32, #tpu.memory_space<vmem>>, vector<2x8x32xf32>
    %1 = vector.shape_cast %0 : vector<2x8x32xf32> to vector<16x32xf32>
    %2 = arith.truncf %1 : vector<16x32xf32> to vector<16x32xbf16>
    %c0_2 = arith.constant 0 : index
    %c0_3 = arith.constant 0 : index
    %3 = vector.load %arg2[%c0_2, %c0_3] : memref<32x96xbf16, #tpu.memory_space<vmem>>, vector<32x96xbf16>
    %cst = arith.constant dense<0.000000e+00> : vector<16x96xf32>
    %4 = tpu.matmul %2, %3, %cst {dimension_numbers = #tpu.dot_dimension_numbers<[1], [0], [0], [1], [0, 0, 1, 1], [], []>} : vector<16x32xbf16>, vector<32x96xbf16>, vector<16x96xf32> -> vector<16x96xf32>
    %c0_4 = arith.constant 0 : index
    %c0_5 = arith.constant 0 : index
    %5 = vector.load %arg3[%c0_4, %c0_5] : memref<1x96xf32, #tpu.memory_space<vmem>>, vector<1x96xf32>
    %6 = vector.broadcast %5 : vector<1x96xf32> to vector<16x96xf32>
    %7 = arith.addf %4, %6 : vector<16x96xf32>
    %8 = arith.truncf %7 : vector<16x96xf32> to vector<16x96xbf16>
    %9 = vector.extract_strided_slice %8 {offsets = [0, 0], sizes = [16, 32], strides = [1, 1]} : vector<16x96xbf16> to vector<16x32xbf16>
    %10 = vector.extract_strided_slice %8 {offsets = [0, 32], sizes = [16, 32], strides = [1, 1]} : vector<16x96xbf16> to vector<16x32xbf16>
    %11 = vector.extract_strided_slice %8 {offsets = [0, 64], sizes = [16, 32], strides = [1, 1]} : vector<16x96xbf16> to vector<16x32xbf16>
    %12 = vector.extract_strided_slice %9 {offsets = [0, 0], sizes = [8, 32], strides = [1, 1]} : vector<16x32xbf16> to vector<8x32xbf16>
    %13 = vector.shape_cast %12 : vector<8x32xbf16> to vector<8x4x8xbf16>
    %14 = tpu.transpose %13, [1, 0, 2] : vector<8x4x8xbf16> -> vector<4x8x8xbf16>
    %15 = vector.extract_strided_slice %10 {offsets = [0, 0], sizes = [8, 32], strides = [1, 1]} : vector<16x32xbf16> to vector<8x32xbf16>
    %16 = vector.shape_cast %15 : vector<8x32xbf16> to vector<8x4x8xbf16>
    %17 = tpu.transpose %16, [1, 0, 2] : vector<8x4x8xbf16> -> vector<4x8x8xbf16>
    %18 = vector.extract_strided_slice %11 {offsets = [0, 0], sizes = [8, 32], strides = [1, 1]} : vector<16x32xbf16> to vector<8x32xbf16>
    %19 = vector.shape_cast %18 : vector<8x32xbf16> to vector<8x4x8xbf16>
    %20 = tpu.transpose %19, [1, 0, 2] : vector<8x4x8xbf16> -> vector<4x8x8xbf16>
    "tpu.trace_start"() <{level = 10 : i32, message = "hqd,hkd->hqk"}> : () -> ()
    %cst_6 = arith.constant dense<0.000000e+00> : vector<4x8x8xf32>
    %21 = tpu.matmul %14, %17, %cst_6 {dimension_numbers = #tpu.dot_dimension_numbers<[2], [2], [1], [1], [0, 0, 0, 1, 1, 1], [0], [0]>} : vector<4x8x8xbf16>, vector<4x8x8xbf16>, vector<4x8x8xf32> -> vector<4x8x8xf32>
    "tpu.trace_stop"() : () -> ()
    %cst_7 = arith.constant dense<0xFF800000> : vector<4x8xf32>
    %22 = vector.multi_reduction <maximumf>, %21, %cst_7 [2] : vector<4x8x8xf32> to vector<4x8xf32>
    %23 = vector.shape_cast %22 : vector<4x8xf32> to vector<4x8x1xf32>
    %24 = vector.broadcast %23 : vector<4x8x1xf32> to vector<4x8x8xf32>
    %25 = arith.subf %21, %24 : vector<4x8x8xf32>
    %26 = math.exp %25 : vector<4x8x8xf32>
    %cst_8 = arith.constant dense<0.000000e+00> : vector<4x8xf32>
    %27 = vector.multi_reduction <add>, %26, %cst_8 [2] : vector<4x8x8xf32> to vector<4x8xf32>
    %28 = vector.shape_cast %27 : vector<4x8xf32> to vector<4x8x1xf32>
    %29 = tpu.reciprocal %28 : vector<4x8x1xf32> -> vector<4x8x1xf32>
    %30 = vector.broadcast %29 : vector<4x8x1xf32> to vector<4x8x8xf32>
    %31 = arith.mulf %26, %30 : vector<4x8x8xf32>
    %32 = arith.truncf %31 : vector<4x8x8xf32> to vector<4x8x8xbf16>
    "tpu.trace_start"() <{level = 10 : i32, message = "hqk,hkd->hqd"}> : () -> ()
    %cst_9 = arith.constant dense<0.000000e+00> : vector<4x8x8xf32>
    %33 = tpu.matmul %32, %20, %cst_9 {dimension_numbers = #tpu.dot_dimension_numbers<[2], [1], [1], [2], [0, 0, 0, 1, 1, 2], [0], [0]>} : vector<4x8x8xbf16>, vector<4x8x8xbf16>, vector<4x8x8xf32> -> vector<4x8x8xf32>
    "tpu.trace_stop"() : () -> ()
    %34 = tpu.transpose %33, [1, 0, 2] : vector<4x8x8xf32> -> vector<8x4x8xf32>
    %35 = vector.shape_cast %34 : vector<8x4x8xf32> to vector<8x32xf32>
    %36 = vector.extract_strided_slice %9 {offsets = [8, 0], sizes = [8, 32], strides = [1, 1]} : vector<16x32xbf16> to vector<8x32xbf16>
    %37 = vector.shape_cast %36 : vector<8x32xbf16> to vector<8x4x8xbf16>
    %38 = tpu.transpose %37, [1, 0, 2] : vector<8x4x8xbf16> -> vector<4x8x8xbf16>
    %39 = vector.extract_strided_slice %10 {offsets = [8, 0], sizes = [8, 32], strides = [1, 1]} : vector<16x32xbf16> to vector<8x32xbf16>
    %40 = vector.shape_cast %39 : vector<8x32xbf16> to vector<8x4x8xbf16>
    %41 = tpu.transpose %40, [1, 0, 2] : vector<8x4x8xbf16> -> vector<4x8x8xbf16>
    %42 = vector.extract_strided_slice %11 {offsets = [8, 0], sizes = [8, 32], strides = [1, 1]} : vector<16x32xbf16> to vector<8x32xbf16>
    %43 = vector.shape_cast %42 : vector<8x32xbf16> to vector<8x4x8xbf16>
    %44 = tpu.transpose %43, [1, 0, 2] : vector<8x4x8xbf16> -> vector<4x8x8xbf16>
    "tpu.trace_start"() <{level = 10 : i32, message = "hqd,hkd->hqk"}> : () -> ()
    %cst_10 = arith.constant dense<0.000000e+00> : vector<4x8x8xf32>
    %45 = tpu.matmul %38, %41, %cst_10 {dimension_numbers = #tpu.dot_dimension_numbers<[2], [2], [1], [1], [0, 0, 0, 1, 1, 1], [0], [0]>} : vector<4x8x8xbf16>, vector<4x8x8xbf16>, vector<4x8x8xf32> -> vector<4x8x8xf32>
    "tpu.trace_stop"() : () -> ()
    %cst_11 = arith.constant dense<0xFF800000> : vector<4x8xf32>
    %46 = vector.multi_reduction <maximumf>, %45, %cst_11 [2] : vector<4x8x8xf32> to vector<4x8xf32>
    %47 = vector.shape_cast %46 : vector<4x8xf32> to vector<4x8x1xf32>
    %48 = vector.broadcast %47 : vector<4x8x1xf32> to vector<4x8x8xf32>
    %49 = arith.subf %45, %48 : vector<4x8x8xf32>
    %50 = math.exp %49 : vector<4x8x8xf32>
    %cst_12 = arith.constant dense<0.000000e+00> : vector<4x8xf32>
    %51 = vector.multi_reduction <add>, %50, %cst_12 [2] : vector<4x8x8xf32> to vector<4x8xf32>
    %52 = vector.shape_cast %51 : vector<4x8xf32> to vector<4x8x1xf32>
    %53 = tpu.reciprocal %52 : vector<4x8x1xf32> -> vector<4x8x1xf32>
    %54 = vector.broadcast %53 : vector<4x8x1xf32> to vector<4x8x8xf32>
    %55 = arith.mulf %50, %54 : vector<4x8x8xf32>
    %56 = arith.truncf %55 : vector<4x8x8xf32> to vector<4x8x8xbf16>
    "tpu.trace_start"() <{level = 10 : i32, message = "hqk,hkd->hqd"}> : () -> ()
    %cst_13 = arith.constant dense<0.000000e+00> : vector<4x8x8xf32>
    %57 = tpu.matmul %56, %44, %cst_13 {dimension_numbers = #tpu.dot_dimension_numbers<[2], [1], [1], [2], [0, 0, 0, 1, 1, 2], [0], [0]>} : vector<4x8x8xbf16>, vector<4x8x8xbf16>, vector<4x8x8xf32> -> vector<4x8x8xf32>
    "tpu.trace_stop"() : () -> ()
    %58 = tpu.transpose %57, [1, 0, 2] : vector<4x8x8xf32> -> vector<8x4x8xf32>
    %59 = vector.shape_cast %58 : vector<8x4x8xf32> to vector<8x32xf32>
    %60 = tpu.concatenate %35, %59 in 0 : vector<8x32xf32>, vector<8x32xf32> -> vector<16x32xf32>
    %61 = arith.truncf %60 : vector<16x32xf32> to vector<16x32xbf16>
    %c0_14 = arith.constant 0 : index
    %c0_15 = arith.constant 0 : index
    %62 = vector.load %arg4[%c0_14, %c0_15] : memref<32x32xbf16, #tpu.memory_space<vmem>>, vector<32x32xbf16>
    %cst_16 = arith.constant dense<0.000000e+00> : vector<16x32xf32>
    %63 = tpu.matmul %61, %62, %cst_16 {dimension_numbers = #tpu.dot_dimension_numbers<[1], [0], [0], [1], [0, 0, 1, 1], [], []>} : vector<16x32xbf16>, vector<32x32xbf16>, vector<16x32xf32> -> vector<16x32xf32>
    %c0_17 = arith.constant 0 : index
    %c0_18 = arith.constant 0 : index
    %64 = vector.load %arg5[%c0_17, %c0_18] : memref<1x32xf32, #tpu.memory_space<vmem>>, vector<1x32xf32>
    %65 = vector.broadcast %64 : vector<1x32xf32> to vector<16x32xf32>
    %66 = arith.addf %63, %65 : vector<16x32xf32>
    %67 = vector.shape_cast %66 : vector<16x32xf32> to vector<2x8x32xf32>
    %c0_19 = arith.constant 0 : index
    %c0_20 = arith.constant 0 : index
    %c0_21 = arith.constant 0 : index
    %68 = vector.load %arg6[%c0_19, %c0_20, %c0_21] : memref<2x8x32xf32, #tpu.memory_space<vmem>>, vector<2x8x32xf32>
    tpu.vector_store %arg6[%c0_19, %c0_20, %c0_21], %67 {strides = array<i32>} : memref<2x8x32xf32, #tpu.memory_space<vmem>>, vector<2x8x32xf32>,
    return
  }
  func.func @transform_0(%arg0: i32) -> (i32, i32, i32) {
    %c0_i32 = arith.constant 0 : i32
    %c0_i32_0 = arith.constant 0 : i32
    %c0_i32_1 = arith.constant 0 : i32
    %c0_i32_2 = arith.constant 0 : i32
    return %c0_i32, %c0_i32_0, %c0_i32_1 : i32, i32, i32
  }
  func.func @transform_1(%arg0: i32) -> (i32, i32) {
    %c0_i32 = arith.constant 0 : i32
    %c0_i32_0 = arith.constant 0 : i32
    %c0_i32_1 = arith.constant 0 : i32
    return %c0_i32, %c0_i32_0 : i32, i32
  }
  func.func @transform_2(%arg0: i32) -> (i32, i32) {
    %c0_i32 = arith.constant 0 : i32
    %c0_i32_0 = arith.constant 0 : i32
    %c0_i32_1 = arith.constant 0 : i32
    return %c0_i32, %c0_i32_0 : i32, i32
  }
  func.func @transform_3(%arg0: i32) -> (i32, i32) {
    %c0_i32 = arith.constant 0 : i32
    %c0_i32_0 = arith.constant 0 : i32
    %c0_i32_1 = arith.constant 0 : i32
    return %c0_i32, %c0_i32_0 : i32, i32
  }
  func.func @transform_4(%arg0: i32) -> (i32, i32) {
    %c0_i32 = arith.constant 0 : i32
    %c0_i32_0 = arith.constant 0 : i32
    %c0_i32_1 = arith.constant 0 : i32
    return %c0_i32, %c0_i32_0 : i32, i32
  }
  func.func @transform_5(%arg0: i32) -> (i32, i32, i32) {
    %c0_i32 = arith.constant 0 : i32
    %c0_i32_0 = arith.constant 0 : i32
    %c0_i32_1 = arith.constant 0 : i32
    %c0_i32_2 = arith.constant 0 : i32
    return %c0_i32, %c0_i32_0, %c0_i32_1 : i32, i32, i32
  }
}

</mosaic_0001>

<bundles_post_ra>
// kernel: tpu_custom_call.1
= control target key start
LH: loop header
LB: loop body
LE: loop exit
PB: predicated region body
PF: predicated region fallthrough
CT: control target
= control target key end

     0   :  { %10 = vsyncpa [#allocation3], 0  ;;  %s3266_s0 = inlined_call_operand.hbm [shape: f32[2,8,32], index: 0, kind: input, shape index: {}]   ;;  %s3267_s1 = inlined_call_operand.hbm [shape: bf16[32,96], index: 1, kind: input, shape index: {}]   ;;  %s3268_s2 = inlined_call_operand.vmem [shape: f32[1,96], index: 2, kind: input, shape index: {}]   ;;  %s3269_s3 = inlined_call_operand.hbm [shape: bf16[32,32], index: 3, kind: input, shape index: {}]   ;;  %s3270_s4 = inlined_call_operand.vmem [shape: f32[1,32], index: 4, kind: input, shape index: {}]   ;;  %s3271_s5 = inlined_call_operand.hbm [shape: f32[2,8,32], index: 5, kind: output, shape index: {}]  }
   0x1   :  { %11 = vsyncpa [#allocation6], 0 }
   0x2   :  { %12 = vsyncpa [#allocation4], 0  ;;  %s2717_s18 = smov [#allocation5]   ;;  %s2623_s22 = scalar_lea.hbm %s3267_s1, 256 }
   0x3   :  { %s30_s19 = sshll.u32 %s2717_s18, 4  ;;  %p2624_p0 = scmp.ne.s32.totalorder %s3267_s1, %s2623_s22  ;;  %s31_s19 = int_to_ptr.vmem [resolvable:$true] %s30_s19 }
   0x4   :  { %p2627_p1 = scmp.lt.u32.totalorder %s2623_s22, %s3267_s1 }
   0x6   :  { %p2629_p2 = pnand %p2627_p1, %p2624_p0 }
   0x8   :  { %2632 = shalt.err (!%p2629_p2)
}
   0x9   :  { %s2633_s27 = scalar_lea.vmem %s31_s19, 256  ;;  %p2638_p4 = scmp.lt.s32.totalorder %s31_s19, %s31_s19 }
   0xa   :  { %p2634_p3 = scmp.ne.s32.totalorder %s31_s19, %s2633_s27  ;;  %p2639_p5 = scmp.lt.s32.totalorder %s2633_s27, %s2633_s27 }
   0xc   :  { %p2640_p6 = por %p2639_p5, %p2638_p4 }
   0xe   :  { %p2641_p7 = pnand %p2640_p6, %p2634_p3 }
  0x10   :  { %2644 = shalt.err (!%p2641_p7)
}
  0x11   :  { %s2718_s28 = smov 64   ;;  %s2719_s29 = smov 4  }
  0x12   :  { %36 = dma.hbm_to_vmem [thread:$0]  %s3267_s1, 256, %s31_s19, [#allocation6], %s2718_s28, %s2718_s28, %s2719_s29  }
  0x13   :  { %s2720_s7 = smov [#allocation2]   ;;  %s2645_s11 = scalar_lea.hbm %s3266_s0, 256 }
  0x14   :  { %s18_s8 = sshll.u32 %s2720_s7, 4  ;;  %p2646_p8 = scmp.ne.s32.totalorder %s3266_s0, %s2645_s11  ;;  %s19_s8 = int_to_ptr.vmem [resolvable:$true] %s18_s8 }
  0x15   :  { %p2649_p9 = scmp.lt.u32.totalorder %s2645_s11, %s3266_s0 }
  0x17   :  { %p2651_p10 = pnand %p2649_p9, %p2646_p8 }
  0x19   :  { %2654 = shalt.err (!%p2651_p10)
}
  0x1a   :  { %s2655_s16 = scalar_lea.vmem %s19_s8, 256  ;;  %p2660_p12 = scmp.lt.s32.totalorder %s19_s8, %s19_s8 }
  0x1b   :  { %p2656_p11 = scmp.ne.s32.totalorder %s19_s8, %s2655_s16  ;;  %p2661_p13 = scmp.lt.s32.totalorder %s2655_s16, %s2655_s16 }
  0x1d   :  { %p2662_p0 = por %p2661_p13, %p2660_p12 }
  0x1f   :  { %p2663_p1 = pnand %p2662_p0, %p2656_p11 }
  0x21   :  { %2666 = shalt.err (!%p2663_p1)
}
  0x22   :  { %s2721_s1 = smov 128   ;;  %s2722_s17 = smov 8  }
  0x23   :  { %24 = dma.hbm_to_vmem [thread:$0]  %s3266_s0, 256, %s19_s8, [#allocation3], %s2721_s1, %s2721_s1, %s2722_s17  }
  0x24   :  { %s2723_s20 = smov [#allocation7]   ;;  %s2667_s24 = scalar_lea.hbm %s3269_s3, 256 }
  0x25   :  { %s44_s21 = sshll.u32 %s2723_s20, 4  ;;  %p2668_p2 = scmp.ne.s32.totalorder %s3269_s3, %s2667_s24  ;;  %s45_s21 = int_to_ptr.vmem [resolvable:$true] %s44_s21 }
  0x26   :  { %p2671_p3 = scmp.lt.u32.totalorder %s2667_s24, %s3269_s3 }
  0x28   :  { %p2673_p4 = pnand %p2671_p3, %p2668_p2 }
  0x2a   :  { %2676 = shalt.err (!%p2673_p4)
}
  0x2b   :  { %s2677_s6 = scalar_lea.vmem %s45_s21, 256  ;;  %p2682_p6 = scmp.lt.s32.totalorder %s45_s21, %s45_s21 }
  0x2c   :  { %p2678_p5 = scmp.ne.s32.totalorder %s45_s21, %s2677_s6  ;;  %p2683_p7 = scmp.lt.s32.totalorder %s2677_s6, %s2677_s6 }
  0x2e   :  { %p2684_p8 = por %p2683_p7, %p2682_p6 }
  0x30   :  { %p2685_p9 = pnand %p2684_p8, %p2678_p5 }
  0x32   :  { %2688 = shalt.err (!%p2685_p9)
}
  0x33   :  { %50 = dma.hbm_to_vmem [thread:$0]  %s3269_s3, 256, %s45_s21, [#allocation6], %s2718_s28, %s2718_s28, %s2719_s29  }
  0x34   :  { %2711 = dma.done.wait [#allocation3], 256  }
  0x35   :  { %2712 = vsyncadd [#allocation3], 4294967040 }
  0x36   :  { %2713 = dma.done.wait [#allocation6], 512  }
  0x37   :  { %2714 = vsyncadd [#allocation6], 4294966784  ;;  %v2724_v0 = vmov 0.0   ;;  %vm2725_vm0 = vmmov 0   ;;  %v2587_v1 = vld [vmem:[#allocation5] sm:$0xff]   ;;  %v2588_v2 = vld [vmem:[#allocation5 + $0x8] sm:$0xff]   ;;  %v145_v19 = vlaneseq }
  0x38   :  { %2441 = vmatprep.subr.bf16.mxu0 %v2724_v0  ;;  %2445 = vmatprep.mubr.msk.bf16.mxu0 %vm2725_vm0, %v2724_v0  ;;  %v63_v3 = vld [vmem:[#allocation2] sm:$0xff]  ;;  %v64_v4 = vld [vmem:[#allocation2 + $0x8] sm:$0xff]  ;;  %vm89_vm1 = vcmask 261120   ;;  %s2726_s8 = smov 104   ;;  %s2727_s9 = smov 120   ;;  %v2732_v41 = vmov 0  }
  0x39   :  { %2449 = vmatprep.subr.bf16.mxu1 %v2724_v0  ;;  %2451 = vmatprep.mubr.msk.bf16.mxu1 %vm2725_vm0, %v2724_v0  ;;  %v65_v5 = vpack.c.bf16 %v64_v4, %v63_v3  ;;  %v2375_v6 = vld [vmem:[%s3268_s2] ss:$0 sm:$0xff]  ;;  %s2728_s10 = smov 96   ;;  %s2729_s11 = smov 112   ;;  %v2730_v17 = vmov 1983009808  }
  0x3a   :  { %2442 = vmatpush3.bf16.msra.mxu0 %v2587_v1  ;;  %v143_v18 = vunpack.c.l.s4 %v2730_v17  ;;  %v146_v21 = vshrl.u32 %v145_v19, 7  ;;  %v2731_v22 = vmov 1934713408   ;;  %vm643_vm2 = vcmask 64512   ;;  %s2733_s2 = smov 16   ;;  %s2735_s14 = smov [#allocation8]  }
  0x3b   :  { %2443 = vmatprep.subr.bf16.mxu0 %v2724_v0  ;;  %v160_v23 = vunpack.c.l.s4 %v2731_v22  ;;  %vm879_vm3 = vcmask 1043456   ;;  %vm1210_vm4 = vcmask 130048   ;;  %vm1212_vm5 = vcmask 195584   ;;  %s2362_s15 = sshll.u32 %s2735_s14, 4  ;;  %s2363_s15 = int_to_ptr.vmem [resolvable:$true] %s2362_s15 }
  0x3c   :  { %v144_v20 = vunpack.c.0.s8 %v143_v18  ;;  %s2689_s16 = scalar_lea.vmem %s2363_s15, 256  ;;  %p2694_p11 = scmp.lt.s32.totalorder %s2363_s15, %s2363_s15 }
  0x3d   :  { %v161_v26 = vunpack.c.0.s8 %v160_v23  ;;  %p2690_p10 = scmp.ne.s32.totalorder %s2363_s15, %s2689_s16  ;;  %p2695_p12 = scmp.lt.s32.totalorder %s2689_s16, %s2689_s16 }
  0x3e   :  { %2444 = vmatpush3.bf16.msra.mxu0 %v2588_v2  ;;  %v2844_v24 = vsub.s32 %v144_v20, %v146_v21 }
  0x3f   :  { %2455 = vmatprep.subr.bf16.mxu0 %v2724_v0  ;;  %v2854_v30 = vsub.s32 %v161_v26, %v146_v21  ;;  %p2696_p13 = por %p2695_p12, %p2694_p11 }
  0x41   :  { %2446 = vmatmul.mubr.msk.bf16.vlgmr.msra.gmra.mrb[0].mxu0 %vm89_vm1, %v65_v5  ;;  %p2697_p0 = pnand %p2696_p13, %p2690_p10 }
  0x42   :  { %2457 = vmatprep.mubr.msk.bf16.mxu0 %vm2725_vm0, %v2724_v0 }
 0x114   :  { %v127_v7 = vpop.f32.mrb[0].mxu0 }
 0x115   :  { %v2447_v8 = vpop.f32.mrb[1].mxu0  ;;  %v128_v10 = vadd.f32 %v2375_v6, %v127_v7 }
 0x116   :  { %v130_v9 = vpop.f32.mrb[2].mxu0 }
 0x117   :  { %v131_v11 = vadd.f32 %v2375_v6, %v130_v9  ;;  %v2448_v12 = vpop.f32.mrb[3].mxu0 }
 0x119   :  { %v2825_v13 = vpack.c.bf16 %v131_v11, %v128_v10 }
 0x11b   :  { %140 = vrot.lane.b32.xlu1 %v2825_v13, %s2726_s8  ;;  %136 = vrot.lane.b32.xlu0 %v2825_v13, %s2727_s9  ;;  %v148_v29 = vrot.slane %v2825_v13, %v2844_v24 }
 0x11f   :  { %303 = vrot.lane.b32.xlu1 %v2825_v13, %s2728_s10  ;;  %138 = vrot.lane.b32.xlu0 %v2825_v13, %s2729_s11 }
 0x18d   :  { %v2832_v14 = vpop.permute.xlu0 %136  ;;  %v2836_v15 = vpop.permute.xlu1 %140 }
 0x18e   :  { %305 = vrot.lane.b32.xlu0 %v2832_v14, %s2728_s10  ;;  %v190_v25 = vrot.slane %v2836_v15, %v2844_v24  ;;  %v182_v27 = vrot.slane %v2832_v14, %v2844_v24 }
 0x190   :  { %v191_v31 = vcombine.low %v182_v27, %v190_v25  ;;  %v192_v34 = vcombine.high %v182_v27, %v190_v25 }
 0x191   :  { %v2838_v16 = vpop.permute.xlu0 %138  ;;  %v304_v40 = vpop.permute.xlu1 %303 }
 0x192   :  { %309 = vrot.lane.b32.xlu0 %v2836_v15, %s2728_s10  ;;  %307 = vrot.lane.b32.xlu1 %v2838_v16, %s2728_s10  ;;  %v156_v28 = vrot.slane %v2838_v16, %v2844_v24  ;;  %v2857_v35 = vrot.slane %v191_v31, %v2854_v30  ;;  %v2866_v38 = vrot.slane %v192_v34, %v2854_v30 }
 0x193   :  { %v318_v47 = vrot.slane %v304_v40, %v2844_v24 }
 0x194   :  { %v157_v32 = vcombine.low %v148_v29, %v156_v28  ;;  %v158_v33 = vcombine.high %v148_v29, %v156_v28  ;;  %v207_v42 = vcombine.high %v2857_v35, %v2732_v41  ;;  %v208_v45 = vcombine.high %v2866_v38, %v2732_v41 }
 0x195   :  { %v214_v46 = vshrl.u32 %v2857_v35, 16  ;;  %v230_v50 = vshrl.u32 %v2866_v38, 16 }
 0x196   :  { %v2860_v36 = vrot.slane %v157_v32, %v2854_v30  ;;  %v2863_v37 = vrot.slane %v158_v33, %v2854_v30  ;;  %v222_v55 = vshrl.u32 %v207_v42, 16  ;;  %v238_v59 = vshrl.u32 %v208_v45, 16 }
 0x198   :  { %v173_v43 = vcombine.high %v2860_v36, %v2732_v41  ;;  %v174_v44 = vcombine.high %v2863_v37, %v2732_v41  ;;  %v213_v48 = vshrl.u32 %v2860_v36, 16  ;;  %v229_v51 = vshrl.u32 %v2863_v37, 16 }
 0x199   :  { %v211_v60 = vpack.i.b16 %v2857_v35, %v2860_v36  ;;  %v227_v34 = vpack.i.b16 %v2866_v38, %v2863_v37 }
 0x19a   :  { %v221_v56 = vshrl.u32 %v173_v43, 16  ;;  %v237_v57 = vshrl.u32 %v174_v44, 16  ;;  %v215_v63 = vpack.i.b16 %v214_v46, %v213_v48  ;;  %v219_v1 = vpack.i.b16 %v207_v42, %v173_v43 }
 0x19b   :  { %v231_v4 = vpack.i.b16 %v230_v50, %v229_v51  ;;  %v235_v5 = vpack.i.b16 %v208_v45, %v174_v44 }
 0x19c   :  { %v223_v8 = vpack.i.b16 %v222_v55, %v221_v56  ;;  %v239_v9 = vpack.i.b16 %v238_v59, %v237_v57 }
 0x19d   :  { %v249_v46 = vcombine.low %v219_v1, %v235_v5  ;;  %v266_v48 = vcombine.low %v215_v63, %v231_v4 }
 0x19e   :  { %v274_v43 = vcombine.low %v223_v8, %v239_v9 }
 0x19f   :  { %v273_v56 = vrot.slane %v266_v48, %v2844_v24 }
 0x1a0   :  { %v281_v38 = vrot.slane %v274_v43, %v2844_v24 }
 0x200   :  { %v306_v39 = vpop.permute.xlu0 %305 }
 0x201   :  { %v352_v52 = vrot.slane %v306_v39, %v2844_v24 }
 0x204   :  { %v310_v49 = vpop.permute.xlu0 %309  ;;  %v308_v53 = vpop.permute.xlu1 %307 }
 0x205   :  { %v360_v54 = vrot.slane %v310_v49, %v2844_v24  ;;  %v326_v58 = vrot.slane %v308_v53, %v2844_v24  ;;  %v241_v49 = vcombine.low %v211_v60, %v227_v34  ;;  %v282_v60 = vcombine.low %v273_v56, %v281_v38 }
 0x207   :  { %v361_v61 = vcombine.low %v352_v52, %v360_v54  ;;  %v362_v62 = vcombine.high %v352_v52, %v360_v54  ;;  %v327_v2 = vcombine.low %v318_v47, %v326_v58  ;;  %v328_v3 = vcombine.high %v318_v47, %v326_v58 }
 0x208   :  { %v256_v54 = vrot.slane %v249_v46, %v2844_v24  ;;  %v248_v58 = vrot.slane %v241_v49, %v2844_v24  ;;  %v289_v5 = vrot.slane %v282_v60, %v2854_v30 }
 0x209   :  { %v369_v6 = vrot.slane %v361_v61, %v2854_v30  ;;  %v376_v7 = vrot.slane %v362_v62, %v2854_v30  ;;  %v335_v10 = vrot.slane %v327_v2, %v2854_v30  ;;  %v342_v11 = vrot.slane %v328_v3, %v2854_v30 }
 0x20a   :  { %v257_v61 = vcombine.low %v248_v58, %v256_v54 }
 0x20b   :  { %v377_v12 = vcombine.high %v369_v6, %v2732_v41  ;;  %v378_v17 = vcombine.high %v376_v7, %v2732_v41  ;;  %v384_v18 = vshrl.u32 %v369_v6, 16  ;;  %v400_v19 = vshrl.u32 %v376_v7, 16 }
 0x20c   :  { %v343_v20 = vcombine.high %v335_v10, %v2732_v41  ;;  %v344_v21 = vcombine.high %v342_v11, %v2732_v41  ;;  %v383_v22 = vshrl.u32 %v335_v10, 16  ;;  %v399_v23 = vshrl.u32 %v342_v11, 16 }
 0x20d   :  { %v381_v25 = vpack.i.b16 %v369_v6, %v335_v10  ;;  %v392_v26 = vshrl.u32 %v377_v12, 16  ;;  %v397_v27 = vpack.i.b16 %v376_v7, %v342_v11  ;;  %v408_v28 = vshrl.u32 %v378_v17, 16 }
 0x20e   :  { %v391_v29 = vshrl.u32 %v343_v20, 16  ;;  %v407_v31 = vshrl.u32 %v344_v21, 16  ;;  %v385_v32 = vpack.i.b16 %v384_v18, %v383_v22  ;;  %v389_v33 = vpack.i.b16 %v377_v12, %v343_v20 }
 0x20f   :  { %v401_v35 = vpack.i.b16 %v400_v19, %v399_v23  ;;  %v405_v36 = vpack.i.b16 %v378_v17, %v344_v21  ;;  %v411_v39 = vcombine.low %v381_v25, %v397_v27  ;;  %v264_v8 = vrot.slane %v257_v61, %v2854_v30 }
 0x210   :  { %v393_v40 = vpack.i.b16 %v392_v26, %v391_v29  ;;  %v409_v42 = vpack.i.b16 %v408_v28, %v407_v31  ;;  %v295_v11 = vshrl.u32 %v289_v5, 16  ;;  %v290_v22 = vcombine.high %v289_v5, %v2732_v41 }
 0x211   :  { %v419_v44 = vcombine.low %v389_v33, %v405_v36  ;;  %v436_v45 = vcombine.low %v385_v32, %v401_v35  ;;  %v418_v50 = vrot.slane %v411_v39, %v2844_v24  ;;  %v293_v17 = vpack.i.b16 %v289_v5, %v264_v8 }
 0x212   :  { %v444_v47 = vcombine.low %v393_v40, %v409_v42  ;;  %v294_v18 = vshrl.u32 %v264_v8, 16  ;;  %v265_v25 = vcombine.high %v264_v8, %v2732_v41  ;;  %v301_v26 = vshrl.u32 %v290_v22, 16 }
 0x213   :  { %v426_v51 = vrot.slane %v419_v44, %v2844_v24  ;;  %v443_v52 = vrot.slane %v436_v45, %v2844_v24 }
 0x214   :  { %v451_v37 = vrot.slane %v444_v47, %v2844_v24  ;;  %v296_v21 = vpack.i.b16 %v295_v11, %v294_v18  ;;  %v299_v27 = vpack.i.b16 %v290_v22, %v265_v25  ;;  %v300_v28 = vshrl.u32 %v265_v25, 16 }
 0x215   :  { %v427_v53 = vcombine.low %v418_v50, %v426_v51 }
 0x216   :  { %v452_v55 = vcombine.low %v443_v52, %v451_v37  ;;  %v302_v29 = vpack.i.b16 %v301_v26, %v300_v28  ;;  %v2946_v37 = vrot.slane %v2825_v13, 4 }
 0x217   :  { %v434_v57 = vrot.slane %v427_v53, %v2854_v30  ;;  %v2953_v53 = vrot.slane %v2832_v14, 4 }
 0x218   :  { %v459_v59 = vrot.slane %v452_v55, %v2854_v30 }
 0x219   :  { %v464_v63 = vshrl.u32 %v434_v57, 16  ;;  %v435_v6 = vcombine.high %v434_v57, %v2732_v41 }
 0x21a   :  { %v463_v62 = vpack.i.b16 %v459_v59, %v434_v57  ;;  %v465_v1 = vshrl.u32 %v459_v59, 16  ;;  %v460_v2 = vcombine.high %v459_v59, %v2732_v41 }
 0x21b   :  { %v470_v12 = vshrl.u32 %v435_v6, 16 }
 0x21c   :  { %v648_v3 = vsel %vm643_vm2, %v463_v62, 0  ;;  %v466_v4 = vpack.i.b16 %v465_v1, %v464_v63  ;;  %v471_v9 = vshrl.u32 %v460_v2, 16  ;;  %v469_v10 = vpack.i.b16 %v460_v2, %v435_v6 }
 0x21d   :  { %2450 = vmatpush3.bf16.xpose.msra.mxu1 %v648_v3 }
 0x21e   :  { %v694_v7 = vsel %vm643_vm2, %v466_v4, 0  ;;  %2461 = vmatprep.subr.bf16.mxu1 %v2724_v0  ;;  %v472_v19 = vpack.i.b16 %v471_v9, %v470_v12  ;;  %v740_v20 = vsel %vm643_vm2, %v469_v10, 0 }
 0x21f   :  { %2456 = vmatpush3.bf16.xpose.msra.mxu0 %v694_v7 }
 0x220   :  { %2467 = vmatprep.subr.bf16.mxu0 %v2724_v0  ;;  %v786_v23 = vsel %vm643_vm2, %v472_v19, 0 }
 0x224   :  { %2452 = vmatmul.mubr.msk.bf16.vlgmr.msra.gmra.mrb[0].mxu1 %vm643_vm2, %v293_v17 }
 0x225   :  { %2462 = vmatpush3.bf16.xpose.msra.mxu1 %v740_v20  ;;  %2463 = vmatprep.mubr.msk.bf16.mxu1 %vm2725_vm0, %v2724_v0 }
 0x226   :  { %2458 = vmatmul.mubr.msk.bf16.vlgmr.msra.gmra.mrb[4].mxu0 %vm643_vm2, %v296_v21  ;;  %2473 = vmatprep.subr.bf16.mxu1 %v2724_v0 }
 0x227   :  { %2468 = vmatpush3.bf16.xpose.msra.mxu0 %v786_v23  ;;  %2469 = vmatprep.mubr.msk.bf16.mxu0 %vm2725_vm0, %v2724_v0 }
 0x228   :  { %2479 = vmatprep.subr.bf16.mxu0 %v2724_v0 }
 0x22c   :  { %2464 = vmatmul.mubr.msk.bf16.vlgmr.msra.gmra.mrb[4].mxu1 %vm643_vm2, %v299_v27 }
 0x22d   :  { %2475 = vmatprep.mubr.msk.bf16.mxu1 %vm2725_vm0, %v2724_v0 }
 0x22e   :  { %2470 = vmatmul.mubr.msk.bf16.vlgmr.msra.gmra.mrb[8].mxu0 %vm643_vm2, %v302_v29 }
 0x22f   :  { %2481 = vmatprep.mubr.msk.bf16.mxu0 %vm2725_vm0, %v2724_v0 }
 0x2f7   :  { %v684_v31 = vpop.f32.mrb[0].mxu1 }
 0x2f8   :  { %v2453_v32 = vpop.f32.mrb[1].mxu1  ;;  %v828_v33 = vsel %vm643_vm2, %v684_v31, -inf }
 0x2f9   :  { %829 = vmax.xlane.f32.xlu1 %v828_v33  ;;  %v687_v34 = vpop.f32.mrb[2].mxu1  ;;  %v730_v35 = vpop.f32.mrb[4].mxu0 }
 0x2fa   :  { %v2454_v36 = vpop.f32.mrb[3].mxu1  ;;  %v2459_v39 = vpop.f32.mrb[5].mxu0  ;;  %v831_v40 = vsel %vm643_vm2, %v730_v35, -inf }
 0x2fb   :  { %832 = vmax.xlane.f32.xlu0 %v831_v40  ;;  %v733_v42 = vpop.f32.mrb[6].mxu0 }
 0x2fc   :  { %v2460_v43 = vpop.f32.mrb[7].mxu0 }
 0x2ff   :  { %v776_v44 = vpop.f32.mrb[4].mxu1 }
 0x300   :  { %v2465_v45 = vpop.f32.mrb[5].mxu1  ;;  %v834_v46 = vsel %vm643_vm2, %v776_v44, -inf }
 0x301   :  { %v779_v47 = vpop.f32.mrb[6].mxu1  ;;  %835 = vmax.xlane.f32.xlu0 %v834_v46  ;;  %v2935_v48 = vpop.f32.mrb[8].mxu0 }
 0x302   :  { %v2466_v49 = vpop.f32.mrb[7].mxu1  ;;  %v2471_v50 = vpop.f32.mrb[9].mxu0  ;;  %v837_v38 = vsel %vm643_vm2, %v2935_v48, -inf }
 0x303   :  { %v825_v51 = vpop.f32.mrb[10].mxu0 }
 0x304   :  { %v2472_v52 = vpop.f32.mrb[11].mxu0 }
 0x30a   :  { %475 = vrot.lane.b32.xlu1 %v2832_v14, %s2718_s28 }
 0x30e   :  { %477 = vrot.lane.b32.xlu1 %v2838_v16, %s2718_s28 }
 0x317   :  { %473 = vrot.lane.b32.xlu0 %v2825_v13, %s2718_s28 }
 0x31b   :  { %479 = vrot.lane.b32.xlu0 %v2836_v15, %s2718_s28 }
 0x31f   :  { %1380 = vrot.lane.b32.xlu0 %v2946_v37, %s2728_s10 }
 0x332   :  { %838 = vmax.xlane.f32.xlu1 %v837_v38 }
 0x343   :  { %1382 = vrot.lane.b32.xlu1 %v2953_v53, %s2728_s10 }
 0x386   :  { %v830_v54 = vpop.xlane.xlu1 %829 }
 0x387   :  { %v840_v55 = vsub.f32 %v684_v31, %v830_v54 }
 0x388   :  { %v833_v56 = vpop.xlane.xlu0 %832 }
 0x389   :  { %v844_v57 = vmul.f32 1.442695, %v840_v55  ;;  %v841_v58 = vsub.f32 %v730_v35, %v833_v56 }
 0x38a   :  { %v476_v13 = vpop.permute.xlu1 %475 }
 0x38b   :  { %2591 = vpow2.f32 %v844_v57  ;;  %v846_v59 = vmul.f32 1.442695, %v841_v58  ;;  %v522_v11 = vrot.slane %v476_v13, %v2844_v24 }
 0x38d   :  { %2593 = vpow2.f32 %v846_v59 }
 0x38e   :  { %v836_v60 = vpop.xlane.xlu0 %835  ;;  %v478_v62 = vpop.permute.xlu1 %477 }
 0x38f   :  { %v842_v61 = vsub.f32 %v776_v44, %v836_v60  ;;  %v496_v14 = vrot.slane %v478_v62, %v2844_v24 }
 0x391   :  { %v848_v63 = vmul.f32 1.442695, %v842_v61 }
 0x392   :  { %v474_v1 = vpop.permute.xlu0 %473 }
 0x393   :  { %2595 = vpow2.f32 %v848_v63  ;;  %v488_v2 = vrot.slane %v474_v1, %v2844_v24 }
 0x395   :  { %v2959_v3 = vpop.eup %2591  ;;  %v497_v4 = vcombine.low %v488_v2, %v496_v14  ;;  %v498_v5 = vcombine.high %v488_v2, %v496_v14 }
 0x396   :  { %v480_v6 = vpop.permute.xlu0 %479  ;;  %v852_v7 = vsel %vm643_vm2, %v2959_v3, 0.0 }
 0x397   :  { %v2963_v8 = vpop.eup %2593  ;;  %v505_v9 = vrot.slane %v497_v4, %v2854_v30  ;;  %v530_v10 = vrot.slane %v480_v6, %v2844_v24  ;;  %853 = vadd.xlane.f32.xlu1 %v852_v7  ;;  %v512_v17 = vrot.slane %v498_v5, %v2854_v30 }
 0x398   :  { %v855_v12 = vsel %vm643_vm2, %v2963_v8, 0.0 }
 0x399   :  { %856 = vadd.xlane.f32.xlu0 %v855_v12  ;;  %v531_v18 = vcombine.low %v522_v11, %v530_v10  ;;  %v532_v19 = vcombine.high %v522_v11, %v530_v10  ;;  %v513_v20 = vcombine.high %v505_v9, %v2732_v41  ;;  %v514_v25 = vcombine.high %v512_v17, %v2732_v41 }
 0x39a   :  { %v553_v26 = vshrl.u32 %v505_v9, 16  ;;  %v569_v27 = vshrl.u32 %v512_v17, 16  ;;  %v2994_v11 = vrot.slane %v2836_v15, 4 }
 0x39b   :  { %v539_v21 = vrot.slane %v531_v18, %v2854_v30  ;;  %v546_v22 = vrot.slane %v532_v19, %v2854_v30  ;;  %v561_v33 = vshrl.u32 %v513_v20, 16  ;;  %v577_v44 = vshrl.u32 %v514_v25, 16 }
 0x39d   :  { %v2974_v23 = vpop.eup %2595  ;;  %v547_v28 = vcombine.high %v539_v21, %v2732_v41  ;;  %v548_v29 = vcombine.high %v546_v22, %v2732_v41  ;;  %v551_v31 = vpack.i.b16 %v539_v21, %v505_v9  ;;  %v554_v32 = vshrl.u32 %v539_v21, 16 }
 0x39e   :  { %v567_v34 = vpack.i.b16 %v546_v22, %v512_v17  ;;  %v570_v35 = vshrl.u32 %v546_v22, 16  ;;  %v858_v36 = vsel %vm643_vm2, %v2974_v23, 0.0  ;;  %v3004_v21 = vrot.slane %v2838_v16, 4  ;;  %v1381_v22 = vpop.permute.xlu0 %1380 }
 0x39f   :  { %v555_v39 = vpack.i.b16 %v554_v32, %v553_v26  ;;  %v559_v40 = vpack.i.b16 %v547_v28, %v513_v20  ;;  %v562_v42 = vshrl.u32 %v547_v28, 16  ;;  %v575_v43 = vpack.i.b16 %v548_v29, %v514_v25  ;;  %859 = vadd.xlane.f32.xlu0 %v858_v36 }
 0x3a0   :  { %v571_v45 = vpack.i.b16 %v570_v35, %v569_v27  ;;  %v578_v46 = vshrl.u32 %v548_v29, 16  ;;  %v581_v47 = vcombine.low %v551_v31, %v567_v34  ;;  %v1233_v36 = vrot.slane %v3004_v21, %v2844_v24 }
 0x3a1   :  { %v563_v49 = vpack.i.b16 %v562_v42, %v561_v33  ;;  %v589_v50 = vcombine.low %v559_v40, %v575_v43  ;;  %v1267_v40 = vrot.slane %v2994_v11, %v2844_v24  ;;  %v1225_v42 = vrot.slane %v2946_v37, %v2844_v24 }
 0x3a2   :  { %v579_v51 = vpack.i.b16 %v578_v46, %v577_v44  ;;  %v606_v52 = vcombine.low %v555_v39, %v571_v45  ;;  %v588_v38 = vrot.slane %v581_v47, %v2844_v24  ;;  %v1259_v39 = vrot.slane %v2953_v53, %v2844_v24 }
 0x3a3   :  { %v596_v54 = vrot.slane %v589_v50, %v2844_v24  ;;  %v1235_v45 = vcombine.high %v1225_v42, %v1233_v36 }
 0x3a4   :  { %v614_v55 = vcombine.low %v563_v49, %v579_v51  ;;  %v613_v57 = vrot.slane %v606_v52, %v2844_v24  ;;  %v1268_v44 = vcombine.low %v1259_v39, %v1267_v40  ;;  %v1269_v47 = vcombine.high %v1259_v39, %v1267_v40 }
 0x3a5   :  { %v597_v56 = vcombine.low %v588_v38, %v596_v54  ;;  %v3041_v52 = vrot.slane %v1235_v45, %v2854_v30 }
 0x3a6   :  { %v621_v58 = vrot.slane %v614_v55, %v2844_v24  ;;  %v3038_v51 = vrot.slane %v1268_v44, %v2854_v30  ;;  %v3044_v54 = vrot.slane %v1269_v47, %v2854_v30 }
 0x3a7   :  { %v604_v13 = vrot.slane %v597_v56, %v2854_v30 }
 0x3a8   :  { %v622_v59 = vcombine.low %v613_v57, %v621_v58  ;;  %v1284_v58 = vcombine.high %v3038_v51, %v2732_v41 }
 0x3a9   :  { %v605_v60 = vcombine.high %v604_v13, %v2732_v41  ;;  %v634_v63 = vshrl.u32 %v604_v13, 16 }
 0x3aa   :  { %v629_v61 = vrot.slane %v622_v59, %v2854_v30 }
 0x3ab   :  { %v640_v2 = vshrl.u32 %v605_v60, 16 }
 0x3ac   :  { %v633_v62 = vpack.i.b16 %v629_v61, %v604_v13  ;;  %v635_v1 = vshrl.u32 %v629_v61, 16  ;;  %v630_v14 = vcombine.high %v629_v61, %v2732_v41  ;;  %v1251_v13 = vcombine.high %v3041_v52, %v2732_v41 }
 0x3ad   :  { %v1291_v61 = vshrl.u32 %v3038_v51, 16 }
 0x3ae   :  { %v881_v4 = vsel %vm879_vm3, %v633_v62, 0  ;;  %v636_v5 = vpack.i.b16 %v635_v1, %v634_v63  ;;  %v639_v6 = vpack.i.b16 %v630_v14, %v605_v60  ;;  %v641_v7 = vshrl.u32 %v630_v14, 16 }
 0x3af   :  { %2474 = vmatpush3.bf16.msra.mxu1 %v881_v4  ;;  %v1285_v60 = vcombine.high %v3044_v54, %v2732_v41  ;;  %v1395_v14 = vrot.slane %v1381_v22, %v2844_v24  ;;  %v1306_v4 = vshrl.u32 %v3041_v52, 16 }
 0x3b0   :  { %v927_v9 = vsel %vm879_vm3, %v636_v5, 0  ;;  %2485 = vmatprep.subr.bf16.mxu1 %v2724_v0  ;;  %v642_v10 = vpack.i.b16 %v641_v7, %v640_v2  ;;  %v973_v16 = vsel %vm879_vm3, %v639_v6, 0  ;;  %v1299_v6 = vshrl.u32 %v1284_v58, 16 }
 0x3b1   :  { %2480 = vmatpush3.bf16.msra.mxu0 %v927_v9  ;;  %v1307_v7 = vshrl.u32 %v3044_v54, 16  ;;  %v1314_v9 = vshrl.u32 %v1251_v13, 16  ;;  %v1312_v22 = vpack.i.b16 %v1285_v60, %v1251_v13 }
 0x3b2   :  { %2491 = vmatprep.subr.bf16.mxu0 %v2724_v0  ;;  %v1019_v34 = vsel %vm879_vm3, %v642_v10, 0 }
 0x3b5   :  { %1386 = vrot.lane.b32.xlu0 %v2994_v11, %s2728_s10 }
 0x3bf   :  { %v839_v12 = vpop.xlane.xlu1 %838 }
 0x3c0   :  { %v843_v17 = vsub.f32 %v2935_v48, %v839_v12  ;;  %v1315_v12 = vshrl.u32 %v1285_v60, 16 }
 0x3c2   :  { %v850_v18 = vmul.f32 1.442695, %v843_v17 }
 0x3c3   :  { %v1383_v15 = vpop.permute.xlu1 %1382 }
 0x3c4   :  { %2597 = vpow2.f32 %v850_v18  ;;  %v1429_v49 = vrot.slane %v1383_v15, %v2844_v24 }
 0x3ce   :  { %v2999_v19 = vpop.eup %2597 }
 0x3cf   :  { %v861_v20 = vsel %vm643_vm2, %v2999_v19, 0.0 }
 0x3d0   :  { %862 = vadd.xlane.f32.xlu1 %v861_v20 }
 0x3e1   :  { %1384 = vrot.lane.b32.xlu1 %v3004_v21, %s2728_s10 }
 0x424   :  { %v854_v25 = vpop.xlane.xlu1 %853 }
 0x425   :  { %2599 = vrcp.f32 %v854_v25 }
 0x426   :  { %v857_v26 = vpop.xlane.xlu0 %856 }
 0x427   :  { %2601 = vrcp.f32 %v857_v26 }
 0x42c   :  { %v860_v48 = vpop.xlane.xlu0 %859 }
 0x42d   :  { %2603 = vrcp.f32 %v860_v48 }
 0x42f   :  { %v2600_v27 = vpop.eup %2599 }
 0x430   :  { %v868_v28 = vmul.f32 %v2600_v27, %v2959_v3  ;;  %v1387_v43 = vpop.permute.xlu0 %1386  ;;  %v1308_v27 = vpack.i.b16 %v1307_v7, %v1306_v4 }
 0x431   :  { %v2602_v29 = vpop.eup %2601  ;;  %v1437_v46 = vrot.slane %v1387_v43, %v2844_v24 }
 0x432   :  { %v869_v31 = vmul.f32 %v2602_v29, %v2963_v8  ;;  %v872_v32 = vpack.c.bf16 %v868_v28, %v868_v28 }
 0x433   :  { %v1438_v38 = vcombine.low %v1429_v49, %v1437_v46  ;;  %v1439_v55 = vcombine.high %v1429_v49, %v1437_v46 }
 0x434   :  { %2476 = vmatmul.mubr.msk.bf16.vlgmr.msra.gmra.mrb[8].mxu1 %vm643_vm2, %v872_v32  ;;  %v873_v33 = vpack.c.bf16 %v869_v31, %v869_v31  ;;  %v1316_v31 = vpack.i.b16 %v1315_v12, %v1314_v9 }
 0x435   :  { %2486 = vmatpush3.bf16.msra.mxu1 %v973_v16  ;;  %2487 = vmatprep.mubr.msk.bf16.mxu1 %vm2725_vm0, %v2724_v0  ;;  %v1446_v59 = vrot.slane %v1438_v38, %v2854_v30  ;;  %v1453_v63 = vrot.slane %v1439_v55, %v2854_v30  ;;  %v1304_v38 = vpack.i.b16 %v3044_v54, %v3041_v52 }
 0x436   :  { %2482 = vmatmul.mubr.msk.bf16.vlgmr.msra.gmra.mrb[12].mxu0 %vm643_vm2, %v873_v33  ;;  %2497 = vmatprep.subr.bf16.mxu1 %v2724_v0 }
 0x437   :  { %2492 = vmatpush3.bf16.msra.mxu0 %v1019_v34  ;;  %2493 = vmatprep.mubr.msk.bf16.mxu0 %vm2725_vm0, %v2724_v0  ;;  %v2604_v3 = vpop.eup %2603  ;;  %v1454_v10 = vcombine.high %v1446_v59, %v2732_v41  ;;  %v1455_v26 = vcombine.high %v1453_v63, %v2732_v41  ;;  %v1461_v32 = vshrl.u32 %v1446_v59, 16  ;;  %v1477_v33 = vshrl.u32 %v1453_v63, 16 }
 0x438   :  { %2503 = vmatprep.subr.bf16.mxu0 %v2724_v0  ;;  %v870_v8 = vmul.f32 %v2604_v3, %v2974_v23  ;;  %v1234_v23 = vcombine.low %v1225_v42, %v1233_v36 }
 0x439   :  { %v1469_v16 = vshrl.u32 %v1454_v10, 16  ;;  %v1485_v39 = vshrl.u32 %v1455_v26, 16 }
 0x43a   :  { %v874_v35 = vpack.c.bf16 %v870_v8, %v870_v8  ;;  %v3035_v50 = vrot.slane %v1234_v23, %v2854_v30 }
 0x43c   :  { %2488 = vmatmul.mubr.msk.bf16.vlgmr.msra.gmra.mrb[12].mxu1 %vm643_vm2, %v874_v35  ;;  %v1250_v57 = vcombine.high %v3035_v50, %v2732_v41  ;;  %v1290_v62 = vshrl.u32 %v3035_v50, 16  ;;  %v1288_v17 = vpack.i.b16 %v3038_v51, %v3035_v50 }
 0x43d   :  { %2499 = vmatprep.mubr.msk.bf16.mxu1 %vm2725_vm0, %v2724_v0 }
 0x43e   :  { %v1298_v2 = vshrl.u32 %v1250_v57, 16  ;;  %v1292_v15 = vpack.i.b16 %v1291_v61, %v1290_v62  ;;  %v1296_v25 = vpack.i.b16 %v1284_v58, %v1250_v57 }
 0x440   :  { %v1300_v48 = vpack.i.b16 %v1299_v6, %v1298_v2 }
 0x442   :  { %v1351_v57 = vcombine.low %v1300_v48, %v1316_v31 }
 0x444   :  { %v1358_v52 = vrot.slane %v1351_v57, %v2844_v24 }
 0x45d   :  { %v863_v56 = vpop.xlane.xlu1 %862 }
 0x45e   :  { %2605 = vrcp.f32 %v863_v56 }
 0x461   :  { %v1385_v1 = vpop.permute.xlu1 %1384 }
 0x462   :  { %v1403_v5 = vrot.slane %v1385_v1, %v2844_v24 }
 0x464   :  { %v1404_v18 = vcombine.low %v1395_v14, %v1403_v5  ;;  %v1405_v20 = vcombine.high %v1395_v14, %v1403_v5 }
 0x466   :  { %v1412_v28 = vrot.slane %v1404_v18, %v2854_v30  ;;  %v1419_v29 = vrot.slane %v1405_v20, %v2854_v30 }
 0x468   :  { %v2606_v34 = vpop.eup %2605  ;;  %v1420_v3 = vcombine.high %v1412_v28, %v2732_v41  ;;  %v1421_v8 = vcombine.high %v1419_v29, %v2732_v41  ;;  %v1458_v35 = vpack.i.b16 %v1446_v59, %v1412_v28  ;;  %v1460_v36 = vshrl.u32 %v1412_v28, 16 }
 0x469   :  { %v871_v40 = vmul.f32 %v2606_v34, %v2999_v19  ;;  %v1474_v42 = vpack.i.b16 %v1453_v63, %v1419_v29  ;;  %v1476_v43 = vshrl.u32 %v1419_v29, 16  ;;  %v1326_v19 = vcombine.low %v1296_v25, %v1312_v22 }
 0x46a   :  { %v1462_v23 = vpack.i.b16 %v1461_v32, %v1460_v36  ;;  %v1466_v44 = vpack.i.b16 %v1454_v10, %v1420_v3  ;;  %v1468_v45 = vshrl.u32 %v1420_v3, 16  ;;  %v1482_v46 = vpack.i.b16 %v1455_v26, %v1421_v8 }
 0x46b   :  { %v1478_v47 = vpack.i.b16 %v1477_v33, %v1476_v43  ;;  %v1484_v49 = vshrl.u32 %v1421_v8, 16  ;;  %v1488_v50 = vcombine.low %v1458_v35, %v1474_v42  ;;  %v875_v51 = vpack.c.bf16 %v871_v40, %v871_v40 }
 0x46c   :  { %v1470_v55 = vpack.i.b16 %v1469_v16, %v1468_v45  ;;  %v1496_v56 = vcombine.low %v1466_v44, %v1482_v46  ;;  %v1343_v59 = vcombine.low %v1292_v15, %v1308_v27  ;;  %v1318_v63 = vcombine.low %v1288_v17, %v1304_v38 }
 0x46d   :  { %v1486_v58 = vpack.i.b16 %v1485_v39, %v1484_v49  ;;  %v1513_v13 = vcombine.low %v1462_v23, %v1478_v47  ;;  %2494 = vmatmul.mubr.msk.bf16.vlgmr.msra.gmra.mrb[16].mxu0 %vm643_vm2, %v875_v51  ;;  %v1495_v60 = vrot.slane %v1488_v50, %v2844_v24  ;;  %v1333_v4 = vrot.slane %v1326_v19, %v2844_v24 }
 0x46e   :  { %v1503_v61 = vrot.slane %v1496_v56, %v2844_v24  ;;  %2505 = vmatprep.mubr.msk.bf16.mxu0 %vm2725_vm0, %v2724_v0  ;;  %v1350_v5 = vrot.slane %v1343_v59, %v2844_v24  ;;  %v1325_v7 = vrot.slane %v1318_v63, %v2844_v24 }
 0x46f   :  { %v1521_v62 = vcombine.low %v1470_v55, %v1486_v58  ;;  %v1520_v54 = vrot.slane %v1513_v13, %v2844_v24 }
 0x470   :  { %v1504_v1 = vcombine.low %v1495_v60, %v1503_v61  ;;  %v1359_v9 = vcombine.low %v1350_v5, %v1358_v52  ;;  %v1334_v17 = vcombine.low %v1325_v7, %v1333_v4 }
 0x471   :  { %v1528_v14 = vrot.slane %v1521_v62, %v2844_v24 }
 0x472   :  { %v1511_v2 = vrot.slane %v1504_v1, %v2854_v30  ;;  %v1366_v22 = vrot.slane %v1359_v9, %v2854_v30  ;;  %v1341_v32 = vrot.slane %v1334_v17, %v2854_v30 }
 0x473   :  { %v1529_v6 = vcombine.low %v1520_v54, %v1528_v14 }
 0x474   :  { %v1512_v10 = vcombine.high %v1511_v2, %v2732_v41  ;;  %v1541_v20 = vshrl.u32 %v1511_v2, 16  ;;  %v1372_v33 = vshrl.u32 %v1366_v22, 16  ;;  %v1370_v34 = vpack.i.b16 %v1366_v22, %v1341_v32 }
 0x475   :  { %v1536_v12 = vrot.slane %v1529_v6, %v2854_v30  ;;  %v1371_v3 = vshrl.u32 %v1341_v32, 16  ;;  %v1367_v36 = vcombine.high %v1366_v22, %v2732_v41  ;;  %v1342_v40 = vcombine.high %v1341_v32, %v2732_v41 }
 0x476   :  { %v1547_v26 = vshrl.u32 %v1512_v10, 16 }
 0x477   :  { %v1540_v18 = vpack.i.b16 %v1536_v12, %v1511_v2  ;;  %v1542_v15 = vshrl.u32 %v1536_v12, 16  ;;  %v1537_v25 = vcombine.high %v1536_v12, %v2732_v41  ;;  %v1373_v35 = vpack.i.b16 %v1372_v33, %v1371_v3 }
 0x478   :  { %v1378_v42 = vshrl.u32 %v1367_v36, 16  ;;  %v1376_v43 = vpack.i.b16 %v1367_v36, %v1342_v40  ;;  %v1377_v23 = vshrl.u32 %v1342_v40, 16 }
 0x479   :  { %v1724_v48 = vsel %vm643_vm2, %v1540_v18, 0  ;;  %v1543_v27 = vpack.i.b16 %v1542_v15, %v1541_v20  ;;  %v1546_v28 = vpack.i.b16 %v1537_v25, %v1512_v10  ;;  %v1548_v29 = vshrl.u32 %v1537_v25, 16 }
 0x47a   :  { %2498 = vmatpush3.bf16.xpose.msra.mxu1 %v1724_v48  ;;  %v1379_v44 = vpack.i.b16 %v1378_v42, %v1377_v23 }
 0x47b   :  { %v1770_v31 = vsel %vm643_vm2, %v1543_v27, 0  ;;  %2509 = vmatprep.subr.bf16.mxu1 %v2724_v0  ;;  %v1549_v16 = vpack.i.b16 %v1548_v29, %v1547_v26  ;;  %v1816_v8 = vsel %vm643_vm2, %v1546_v28, 0 }
 0x47c   :  { %2504 = vmatpush3.bf16.xpose.msra.mxu0 %v1770_v31 }
 0x47d   :  { %2515 = vmatprep.subr.bf16.mxu0 %v2724_v0  ;;  %v1862_v39 = vsel %vm643_vm2, %v1549_v16, 0 }
 0x481   :  { %2500 = vmatmul.mubr.msk.bf16.vlgmr.msra.gmra.mrb[16].mxu1 %vm643_vm2, %v1370_v34 }
 0x482   :  { %2510 = vmatpush3.bf16.xpose.msra.mxu1 %v1816_v8  ;;  %2511 = vmatprep.mubr.msk.bf16.mxu1 %vm2725_vm0, %v2724_v0 }
 0x483   :  { %2506 = vmatmul.mubr.msk.bf16.vlgmr.msra.gmra.mrb[20].mxu0 %vm643_vm2, %v1373_v35  ;;  %2521 = vmatprep.subr.bf16.mxu1 %v2724_v0 }
 0x484   :  { %2516 = vmatpush3.bf16.xpose.msra.mxu0 %v1862_v39  ;;  %2517 = vmatprep.mubr.msk.bf16.mxu0 %vm2725_vm0, %v2724_v0 }
 0x485   :  { %2527 = vmatprep.subr.bf16.mxu0 %v2724_v0 }
 0x489   :  { %2512 = vmatmul.mubr.msk.bf16.vlgmr.msra.gmra.mrb[20].mxu1 %vm643_vm2, %v1376_v43 }
 0x48a   :  { %2523 = vmatprep.mubr.msk.bf16.mxu1 %vm2725_vm0, %v2724_v0 }
 0x48b   :  { %2518 = vmatmul.mubr.msk.bf16.vlgmr.msra.gmra.mrb[24].mxu0 %vm643_vm2, %v1379_v44 }
 0x48c   :  { %2529 = vmatprep.mubr.msk.bf16.mxu0 %vm2725_vm0, %v2724_v0 }
 0x507   :  { %v917_v45 = vpop.f32.mrb[8].mxu1 }
 0x508   :  { %v2477_v46 = vpop.f32.mrb[9].mxu1 }
 0x509   :  { %v920_v47 = vpop.f32.mrb[10].mxu1  ;;  %v963_v49 = vpop.f32.mrb[12].mxu0 }
 0x50a   :  { %v2478_v50 = vpop.f32.mrb[11].mxu1  ;;  %v2483_v51 = vpop.f32.mrb[13].mxu0 }
 0x50b   :  { %v966_v38 = vpop.f32.mrb[14].mxu0 }
 0x50c   :  { %v2484_v55 = vpop.f32.mrb[15].mxu0 }
 0x50f   :  { %v1009_v56 = vpop.f32.mrb[12].mxu1 }
 0x510   :  { %v1061_v57 = vcombine.low %v917_v45, %v1009_v56  ;;  %v1062_v58 = vcombine.high %v917_v45, %v1009_v56  ;;  %v2489_v13 = vpop.f32.mrb[13].mxu1 }
 0x511   :  { %v1012_v19 = vpop.f32.mrb[14].mxu1 }
 0x512   :  { %v2490_v59 = vpop.f32.mrb[15].mxu1  ;;  %v1069_v52 = vrot.slane %v1061_v57, %v2844_v24  ;;  %v1076_v54 = vrot.slane %v1062_v58, %v2844_v24 }
 0x540   :  { %v1055_v60 = vpop.f32.mrb[16].mxu0 }
 0x541   :  { %v1077_v61 = vcombine.low %v963_v49, %v1055_v60  ;;  %v1078_v62 = vcombine.high %v963_v49, %v1055_v60  ;;  %v2495_v63 = vpop.f32.mrb[17].mxu0 }
 0x542   :  { %v1058_v1 = vpop.f32.mrb[18].mxu0 }
 0x543   :  { %v1085_v14 = vrot.slane %v1077_v61, %v2844_v24  ;;  %v1092_v2 = vrot.slane %v1078_v62, %v2844_v24  ;;  %v2496_v4 = vpop.f32.mrb[19].mxu0 }
 0x545   :  { %v1093_v5 = vcombine.low %v1069_v52, %v1085_v14  ;;  %v1094_v6 = vcombine.high %v1069_v52, %v1085_v14  ;;  %v1109_v7 = vcombine.low %v1076_v54, %v1092_v2  ;;  %v1110_v9 = vcombine.high %v1076_v54, %v1092_v2 }
 0x547   :  { %v1101_v10 = vrot.slane %v1093_v5, %v2854_v30  ;;  %v1108_v12 = vrot.slane %v1094_v6, %v2854_v30  ;;  %v1117_v17 = vrot.slane %v1109_v7, %v2854_v30  ;;  %v1124_v18 = vrot.slane %v1110_v9, %v2854_v30 }
 0x549   :  { %v1129_v20 = vcombine.low %v1101_v10, %v1108_v12  ;;  %v2387_v15 = vcombine.high %v1101_v10, %v1108_v12  ;;  %v1145_v25 = vcombine.low %v1117_v17, %v1124_v18  ;;  %v2388_v22 = vcombine.high %v1117_v17, %v1124_v18 }
 0x54b   :  { %v1136_v26 = vrot.slane %v1129_v20, %v2844_v24  ;;  %v1144_v48 = vrot.slane %v2387_v15, %v2844_v24  ;;  %v1152_v27 = vrot.slane %v1145_v25, %v2844_v24  ;;  %v1160_v28 = vrot.slane %v2388_v22, %v2844_v24 }
 0x54d   :  { %v1162_v29 = vcombine.high %v1136_v26, %v1144_v48  ;;  %v1178_v31 = vcombine.high %v1152_v27, %v1160_v28  ;;  %v1161_v32 = vcombine.low %v1136_v26, %v1144_v48  ;;  %v1177_v16 = vcombine.low %v1152_v27, %v1160_v28 }
 0x54f   :  { %v3125_v33 = vrot.slane %v1162_v29, %v2854_v30  ;;  %v3128_v34 = vrot.slane %v1178_v31, %v2854_v30  ;;  %v3131_v3 = vrot.slane %v1161_v32, %v2854_v30  ;;  %v3134_v8 = vrot.slane %v1177_v16, %v2854_v30 }
 0x551   :  { %v1195_v35 = vcombine.low %v3125_v33, %v3128_v34  ;;  %v1193_v36 = vcombine.low %v3131_v3, %v3134_v8  ;;  %v1194_v39 = vcombine.high %v3131_v3, %v3134_v8  ;;  %v1196_v40 = vcombine.high %v3125_v33, %v3128_v34  ;;  %v2399_v3 = vld [vmem:[%s3270_s4] ss:$0 sm:$0xff] }
 0x554   :  { %v1760_v42 = vpop.f32.mrb[16].mxu1 }
 0x555   :  { %v2501_v43 = vpop.f32.mrb[17].mxu1  ;;  %v1904_v23 = vsel %vm643_vm2, %v1760_v42, -inf }
 0x556   :  { %1905 = vmax.xlane.f32.xlu1 %v1904_v23  ;;  %v1763_v44 = vpop.f32.mrb[18].mxu1  ;;  %v1806_v45 = vpop.f32.mrb[20].mxu0 }
 0x557   :  { %v2502_v46 = vpop.f32.mrb[19].mxu1  ;;  %v2507_v47 = vpop.f32.mrb[21].mxu0  ;;  %v1907_v49 = vsel %vm643_vm2, %v1806_v45, -inf }
 0x558   :  { %1908 = vmax.xlane.f32.xlu0 %v1907_v49  ;;  %v1809_v50 = vpop.f32.mrb[22].mxu0 }
 0x559   :  { %v2508_v51 = vpop.f32.mrb[23].mxu0 }
 0x55c   :  { %v1852_v38 = vpop.f32.mrb[20].mxu1 }
 0x55d   :  { %v2513_v55 = vpop.f32.mrb[21].mxu1  ;;  %v1910_v56 = vsel %vm643_vm2, %v1852_v38, -inf }
 0x55e   :  { %v1855_v57 = vpop.f32.mrb[22].mxu1  ;;  %1911 = vmax.xlane.f32.xlu0 %v1910_v56  ;;  %v1898_v58 = vpop.f32.mrb[24].mxu0 }
 0x55f   :  { %v2514_v13 = vpop.f32.mrb[23].mxu1  ;;  %v2519_v19 = vpop.f32.mrb[25].mxu0  ;;  %v1913_v59 = vsel %vm643_vm2, %v1898_v58, -inf }
 0x560   :  { %1914 = vmax.xlane.f32.xlu1 %v1913_v59  ;;  %v1901_v60 = vpop.f32.mrb[26].mxu0 }
 0x561   :  { %v2520_v61 = vpop.f32.mrb[27].mxu0 }
 0x571   :  { %1552 = vrot.lane.b32.xlu1 %v2953_v53, %s2718_s28 }
 0x574   :  { %1550 = vrot.lane.b32.xlu0 %v2946_v37, %s2718_s28 }
 0x5e3   :  { %v1906_v62 = vpop.xlane.xlu1 %1905 }
 0x5e4   :  { %v1916_v63 = vsub.f32 %v1760_v42, %v1906_v62 }
 0x5e5   :  { %v1909_v1 = vpop.xlane.xlu0 %1908 }
 0x5e6   :  { %v1920_v52 = vmul.f32 1.442695, %v1916_v63  ;;  %v1917_v54 = vsub.f32 %v1806_v45, %v1909_v1 }
 0x5e8   :  { %2607 = vpow2.f32 %v1920_v52  ;;  %v1922_v14 = vmul.f32 1.442695, %v1917_v54 }
 0x5ea   :  { %2609 = vpow2.f32 %v1922_v14 }
 0x5eb   :  { %v1912_v6 = vpop.xlane.xlu0 %1911 }
 0x5ec   :  { %v1918_v9 = vsub.f32 %v1852_v38, %v1912_v6 }
 0x5ed   :  { %v1915_v37 = vpop.xlane.xlu1 %1914 }
 0x5ee   :  { %v1919_v7 = vsub.f32 %v1898_v58, %v1915_v37  ;;  %v1924_v12 = vmul.f32 1.442695, %v1918_v9 }
 0x5f0   :  { %v1926_v10 = vmul.f32 1.442695, %v1919_v7 }
 0x5f1   :  { %v1553_v15 = vpop.permute.xlu1 %1552 }
 0x5f2   :  { %v3152_v2 = vpop.eup %2607  ;;  %2611 = vpow2.f32 %v1926_v10  ;;  %v1599_v48 = vrot.slane %v1553_v15, %v2844_v24 }
 0x5f3   :  { %v1928_v4 = vsel %vm643_vm2, %v3152_v2, 0.0  ;;  %2613 = vpow2.f32 %v1924_v12 }
 0x5f4   :  { %v3156_v5 = vpop.eup %2609  ;;  %1929 = vadd.xlane.f32.xlu0 %v1928_v4 }
 0x5f5   :  { %v1931_v53 = vsel %vm643_vm2, %v3156_v5, 0.0 }
 0x5f6   :  { %1932 = vadd.xlane.f32.xlu1 %v1931_v53 }
 0x5fc   :  { %v3164_v17 = vpop.eup %2611 }
 0x5fd   :  { %v3166_v18 = vpop.eup %2613  ;;  %v1937_v20 = vsel %vm643_vm2, %v3164_v17, 0.0 }
 0x607   :  { %1554 = vrot.lane.b32.xlu1 %v3004_v21, %s2718_s28  ;;  %v1934_v21 = vsel %vm643_vm2, %v3166_v18, 0.0 }
 0x60a   :  { %1556 = vrot.lane.b32.xlu0 %v2994_v11, %s2718_s28  ;;  %v1551_v11 = vpop.permute.xlu0 %1550  ;;  %s2734_s28 = smov 24  }
 0x60b   :  { %v1565_v29 = vrot.slane %v1551_v11, %v2844_v24 }
 0x629   :  { %1938 = vadd.xlane.f32.xlu0 %v1937_v20 }
 0x62b   :  { %1935 = vadd.xlane.f32.xlu1 %v1934_v21 }
 0x681   :  { %v1930_v25 = vpop.xlane.xlu0 %1929 }
 0x682   :  { %2615 = vrcp.f32 %v1930_v25 }
 0x683   :  { %v1933_v22 = vpop.xlane.xlu1 %1932 }
 0x684   :  { %2617 = vrcp.f32 %v1933_v22 }
 0x685   :  { %v1557_v26 = vpop.permute.xlu0 %1556 }
 0x686   :  { %v1607_v27 = vrot.slane %v1557_v26, %v2844_v24 }
 0x687   :  { %v1555_v28 = vpop.permute.xlu1 %1554 }
 0x688   :  { %v1608_v31 = vcombine.low %v1599_v48, %v1607_v27  ;;  %v1609_v32 = vcombine.high %v1599_v48, %v1607_v27  ;;  %v1573_v16 = vrot.slane %v1555_v28, %v2844_v24 }
 0x68a   :  { %v1616_v42 = vrot.slane %v1608_v31, %v2854_v30  ;;  %v1623_v43 = vrot.slane %v1609_v32, %v2854_v30  ;;  %v1574_v23 = vcombine.low %v1565_v29, %v1573_v16  ;;  %v1575_v44 = vcombine.high %v1565_v29, %v1573_v16 }
 0x68c   :  { %v1624_v45 = vcombine.high %v1616_v42, %v2732_v41  ;;  %v1625_v46 = vcombine.high %v1623_v43, %v2732_v41  ;;  %v1582_v47 = vrot.slane %v1574_v23, %v2854_v30  ;;  %v1589_v49 = vrot.slane %v1575_v44, %v2854_v30  ;;  %v2616_v10 = vpop.eup %2615 }
 0x68d   :  { %v1631_v50 = vshrl.u32 %v1616_v42, 16  ;;  %v1647_v51 = vshrl.u32 %v1623_v43, 16  ;;  %v1944_v48 = vmul.f32 %v2616_v10, %v3152_v2 }
 0x68e   :  { %v1639_v38 = vshrl.u32 %v1624_v45, 16  ;;  %v1590_v55 = vcombine.high %v1582_v47, %v2732_v41  ;;  %v1591_v56 = vcombine.high %v1589_v49, %v2732_v41  ;;  %v1628_v57 = vpack.i.b16 %v1616_v42, %v1582_v47  ;;  %v2618_v11 = vpop.eup %2617 }
 0x68f   :  { %v1655_v58 = vshrl.u32 %v1625_v46, 16  ;;  %v1630_v13 = vshrl.u32 %v1582_v47, 16  ;;  %v1644_v19 = vpack.i.b16 %v1623_v43, %v1589_v49  ;;  %v1646_v59 = vshrl.u32 %v1589_v49, 16 }
 0x690   :  { %v1636_v60 = vpack.i.b16 %v1624_v45, %v1590_v55  ;;  %v1638_v61 = vshrl.u32 %v1590_v55, 16  ;;  %v1652_v62 = vpack.i.b16 %v1625_v46, %v1591_v56  ;;  %v1654_v63 = vshrl.u32 %v1591_v56, 16 }
 0x691   :  { %v1632_v1 = vpack.i.b16 %v1631_v50, %v1630_v13  ;;  %v1648_v52 = vpack.i.b16 %v1647_v51, %v1646_v59  ;;  %v1658_v54 = vcombine.low %v1628_v57, %v1644_v19  ;;  %v1945_v32 = vmul.f32 %v2618_v11, %v3156_v5 }
 0x692   :  { %v1640_v14 = vpack.i.b16 %v1639_v38, %v1638_v61  ;;  %v1656_v4 = vpack.i.b16 %v1655_v58, %v1654_v63  ;;  %v1666_v53 = vcombine.low %v1636_v60, %v1652_v62  ;;  %v1948_v46 = vpack.c.bf16 %v1944_v48, %v1944_v48 }
 0x693   :  { %v1683_v37 = vcombine.low %v1632_v1, %v1648_v52  ;;  %v1665_v6 = vrot.slane %v1658_v54, %v2844_v24  ;;  %v1949_v47 = vpack.c.bf16 %v1945_v32, %v1945_v32 }
 0x694   :  { %v1691_v7 = vcombine.low %v1640_v14, %v1656_v4  ;;  %v1673_v9 = vrot.slane %v1666_v53, %v2844_v24 }
 0x695   :  { %v1690_v20 = vrot.slane %v1683_v37, %v2844_v24 }
 0x696   :  { %v1674_v12 = vcombine.low %v1665_v6, %v1673_v9  ;;  %v1698_v21 = vrot.slane %v1691_v7, %v2844_v24 }
 0x698   :  { %v1681_v15 = vrot.slane %v1674_v12, %v2854_v30  ;;  %v1699_v25 = vcombine.low %v1690_v20, %v1698_v21 }
 0x69a   :  { %v1706_v22 = vrot.slane %v1699_v25, %v2854_v30  ;;  %v1682_v26 = vcombine.high %v1681_v15, %v2732_v41  ;;  %v1711_v28 = vshrl.u32 %v1681_v15, 16 }
 0x69c   :  { %v1710_v27 = vpack.i.b16 %v1706_v22, %v1681_v15  ;;  %v1712_v29 = vshrl.u32 %v1706_v22, 16  ;;  %v1707_v31 = vcombine.high %v1706_v22, %v2732_v41  ;;  %v1717_v16 = vshrl.u32 %v1682_v26, 16 }
 0x69e   :  { %v1956_v42 = vsel %vm879_vm3, %v1710_v27, 0  ;;  %v1713_v43 = vpack.i.b16 %v1712_v29, %v1711_v28  ;;  %v1716_v23 = vpack.i.b16 %v1707_v31, %v1682_v26  ;;  %v1718_v44 = vshrl.u32 %v1707_v31, 16 }
 0x69f   :  { %2522 = vmatpush3.bf16.msra.mxu1 %v1956_v42 }
 0x6a0   :  { %v2002_v45 = vsel %vm879_vm3, %v1713_v43, 0  ;;  %2533 = vmatprep.subr.bf16.mxu1 %v2724_v0  ;;  %v1719_v2 = vpack.i.b16 %v1718_v44, %v1717_v16  ;;  %v2048_v41 = vsel %vm879_vm3, %v1716_v23, 0  ;;  %v2589_v43 = vld [vmem:[#allocation7] sm:$0xff]  }
 0x6a1   :  { %2528 = vmatpush3.bf16.msra.mxu0 %v2002_v45 }
 0x6a2   :  { %2524 = vmatmul.mubr.msk.bf16.vlgmr.msra.gmra.mrb[24].mxu1 %vm643_vm2, %v1948_v46  ;;  %2539 = vmatprep.subr.bf16.mxu0 %v2724_v0  ;;  %v2094_v5 = vsel %vm879_vm3, %v1719_v2, 0 }
 0x6a3   :  { %2534 = vmatpush3.bf16.msra.mxu1 %v2048_v41  ;;  %2535 = vmatprep.mubr.msk.bf16.mxu1 %vm2725_vm0, %v2724_v0 }
 0x6a4   :  { %2530 = vmatmul.mubr.msk.bf16.vlgmr.msra.gmra.mrb[28].mxu0 %vm643_vm2, %v1949_v47  ;;  %2545 = vmatprep.subr.bf16.mxu1 %v2724_v0 }
 0x6a5   :  { %2540 = vmatpush3.bf16.msra.mxu0 %v2094_v5  ;;  %2541 = vmatprep.mubr.msk.bf16.mxu0 %vm2725_vm0, %v2724_v0 }
 0x6b6   :  { %v1939_v49 = vpop.xlane.xlu0 %1938 }
 0x6b7   :  { %2619 = vrcp.f32 %v1939_v49 }
 0x6b8   :  { %v1936_v50 = vpop.xlane.xlu1 %1935 }
 0x6b9   :  { %2621 = vrcp.f32 %v1936_v50 }
 0x6c1   :  { %v2620_v51 = vpop.eup %2619 }
 0x6c2   :  { %v1947_v38 = vmul.f32 %v2620_v51, %v3164_v17 }
 0x6c3   :  { %v2622_v55 = vpop.eup %2621 }
 0x6c4   :  { %v1946_v56 = vmul.f32 %v2622_v55, %v3166_v18  ;;  %v1951_v57 = vpack.c.bf16 %v1947_v38, %v1947_v38  ;;  %v2590_v55 = vld [vmem:[#allocation7 + $0x8] sm:$0xff]  }
 0x6c6   :  { %2542 = vmatmul.mubr.msk.bf16.vlgmr.msra.gmra.mrb[32].mxu0 %vm643_vm2, %v1951_v57  ;;  %v1950_v58 = vpack.c.bf16 %v1946_v56, %v1946_v56 }
 0x6c8   :  { %2536 = vmatmul.mubr.msk.bf16.vlgmr.msra.gmra.mrb[28].mxu1 %vm643_vm2, %v1950_v58 }
 0x6c9   :  { %2549 = vmatprep.mubr.msk.bf16.mxu1 %vm2725_vm0, %v2724_v0  ;;  %2546 = vmatpush3.bf16.msra.mxu1 %v2589_v43 }
 0x6ca   :  { %2547 = vmatprep.subr.bf16.mxu1 %v2724_v0 }
 0x6cd   :  { %2548 = vmatpush3.bf16.msra.mxu1 %v2590_v55 }
 0x775   :  { %v1992_v13 = vpop.f32.mrb[24].mxu1 }
 0x776   :  { %v2525_v19 = vpop.f32.mrb[25].mxu1 }
 0x777   :  { %v1995_v59 = vpop.f32.mrb[26].mxu1  ;;  %v2038_v60 = vpop.f32.mrb[28].mxu0 }
 0x778   :  { %v2526_v61 = vpop.f32.mrb[27].mxu1  ;;  %v2531_v62 = vpop.f32.mrb[29].mxu0 }
 0x779   :  { %v2041_v63 = vpop.f32.mrb[30].mxu0 }
 0x77a   :  { %v2532_v17 = vpop.f32.mrb[31].mxu0 }
 0x799   :  { %v2130_v1 = vpop.f32.mrb[32].mxu0 }
 0x79a   :  { %v2152_v52 = vcombine.low %v2038_v60, %v2130_v1  ;;  %v2153_v18 = vcombine.high %v2038_v60, %v2130_v1  ;;  %v2543_v54 = vpop.f32.mrb[33].mxu0 }
 0x79b   :  { %v2084_v14 = vpop.f32.mrb[28].mxu1  ;;  %v2133_v4 = vpop.f32.mrb[34].mxu0 }
 0x79c   :  { %v2136_v53 = vcombine.low %v1992_v13, %v2084_v14  ;;  %v2137_v37 = vcombine.high %v1992_v13, %v2084_v14  ;;  %v2537_v6 = vpop.f32.mrb[29].mxu1  ;;  %v2544_v7 = vpop.f32.mrb[35].mxu0  ;;  %v2160_v10 = vrot.slane %v2152_v52, %v2844_v24  ;;  %v2167_v12 = vrot.slane %v2153_v18, %v2844_v24 }
 0x79d   :  { %v2087_v9 = vpop.f32.mrb[30].mxu1 }
 0x79e   :  { %v2144_v20 = vrot.slane %v2136_v53, %v2844_v24  ;;  %v2151_v21 = vrot.slane %v2137_v37, %v2844_v24  ;;  %v2538_v11 = vpop.f32.mrb[31].mxu1 }
 0x7a0   :  { %v2168_v15 = vcombine.low %v2144_v20, %v2160_v10  ;;  %v2169_v25 = vcombine.high %v2144_v20, %v2160_v10  ;;  %v2184_v22 = vcombine.low %v2151_v21, %v2167_v12  ;;  %v2185_v26 = vcombine.high %v2151_v21, %v2167_v12 }
 0x7a2   :  { %v2176_v48 = vrot.slane %v2168_v15, %v2854_v30  ;;  %v2183_v27 = vrot.slane %v2169_v25, %v2854_v30  ;;  %v2192_v28 = vrot.slane %v2184_v22, %v2854_v30  ;;  %v2199_v29 = vrot.slane %v2185_v26, %v2854_v30 }
 0x7a4   :  { %v2204_v31 = vcombine.low %v2176_v48, %v2183_v27  ;;  %v2397_v32 = vcombine.high %v2176_v48, %v2183_v27  ;;  %v2220_v16 = vcombine.low %v2192_v28, %v2199_v29  ;;  %v2398_v42 = vcombine.high %v2192_v28, %v2199_v29 }
 0x7a6   :  { %v2211_v23 = vrot.slane %v2204_v31, %v2844_v24  ;;  %v2219_v44 = vrot.slane %v2397_v32, %v2844_v24  ;;  %v2227_v45 = vrot.slane %v2220_v16, %v2844_v24  ;;  %v2235_v46 = vrot.slane %v2398_v42, %v2844_v24 }
 0x7a8   :  { %v2237_v2 = vcombine.high %v2211_v23, %v2219_v44  ;;  %v2253_v41 = vcombine.high %v2227_v45, %v2235_v46  ;;  %v2236_v47 = vcombine.low %v2211_v23, %v2219_v44  ;;  %v2252_v5 = vcombine.low %v2227_v45, %v2235_v46 }
 0x7aa   :  { %v2251_v49 = vrot.slane %v2237_v2, %v2854_v30  ;;  %v2267_v50 = vrot.slane %v2253_v41, %v2854_v30  ;;  %v2244_v51 = vrot.slane %v2236_v47, %v2854_v30  ;;  %v2260_v38 = vrot.slane %v2252_v5, %v2854_v30 }
 0x7ac   :  { %v2270_v56 = vcombine.low %v2251_v49, %v2267_v50  ;;  %v2269_v57 = vcombine.high %v2244_v51, %v2260_v38  ;;  %v2268_v58 = vcombine.low %v2244_v51, %v2260_v38  ;;  %v2271_v24 = vcombine.high %v2251_v49, %v2267_v50 }
 0x7ae   :  { %v2577_v13 = vpack.i.bf16 %v2270_v56, %v1195_v35  ;;  %v2572_v0 = vpack.i.bf16 %v2269_v57, %v1194_v39  ;;  %v2582_v19 = vpack.i.bf16 %v2271_v24, %v1196_v40 }
 0x7b0   :  { %2578 = vrot.lane.b32.xlu1 %v2577_v13, %s2733_s2  ;;  %2573 = vrot.lane.b32.xlu0 %v2572_v0, %s2722_s17 }
 0x7b4   :  { %2583 = vrot.lane.b32.xlu1 %v2582_v19, %s2734_s28 }
 0x822   :  { %v2579_v30 = vpop.permute.xlu1 %2578  ;;  %v2574_v59 = vpop.permute.xlu0 %2573 }
 0x823   :  { %v2576_v60 = vunpack.i.h.bf16 %v2574_v59  ;;  %v2575_v61 = vunpack.i.l.bf16 %v2574_v59  ;;  %v2581_v62 = vunpack.i.h.bf16 %v2579_v30  ;;  %v2580_v35 = vunpack.i.l.bf16 %v2579_v30 }
 0x825   :  { %v1209_v39 = vsel %vm643_vm2, %v1193_v36, %v2575_v61  ;;  %v2284_v33 = vsel %vm643_vm2, %v2268_v58, %v2576_v60 }
 0x826   :  { %v2584_v34 = vpop.permute.xlu1 %2583  ;;  %v1211_v17 = vsel %vm1210_vm4, %v1209_v39, %v2580_v35  ;;  %v2285_v1 = vsel %vm1210_vm4, %v2284_v33, %v2581_v62 }
 0x827   :  { %v2586_v40 = vunpack.i.h.bf16 %v2584_v34  ;;  %v2585_v63 = vunpack.i.l.bf16 %v2584_v34 }
 0x829   :  { %v1213_v52 = vsel %vm1212_vm5, %v1211_v17, %v2585_v63  ;;  %v2286_v18 = vsel %vm1212_vm5, %v2285_v1, %v2586_v40 }
 0x82a   :  { %v2287_v54 = vpack.c.bf16 %v2286_v18, %v1213_v52 }
 0x82c   :  { %2550 = vmatmul.mubr.msk.bf16.vlgmr.msra.gmra.mrb[32].mxu1 %vm89_vm1, %v2287_v54 }
 0x8ff   :  { %v2348_v8 = vpop.f32.mrb[32].mxu1 }
 0x900   :  { %v2349_v36 = vadd.f32 %v2399_v3, %v2348_v8  ;;  %v2551_v14 = vpop.f32.mrb[33].mxu1 }
 0x901   :  { %v2351_v4 = vpop.f32.mrb[34].mxu1 }
 0x902   :  { %2355 = vst.msk [vmem:[#allocation8] sm:$0xff] %vm89_vm1, %v2349_v36  ;;  %v2352_v53 = vadd.f32 %v2399_v3, %v2351_v4  ;;  %v2552_v37 = vpop.f32.mrb[35].mxu1 }
 0x904   :  { %2356 = vst.msk [vmem:[#allocation8 + $0x8] sm:$0xff] %vm89_vm1, %v2352_v53 }
 0x905   :  { %2700 = shalt.err (!%p2697_p0)
}
 0x906   :  { %s2701_s19 = scalar_lea.hbm %s3271_s5, 256 }
 0x907   :  { %p2702_p1 = scmp.ne.s32.totalorder %s3271_s5, %s2701_s19  ;;  %p2705_p2 = scmp.lt.u32.totalorder %s2701_s19, %s3271_s5 }
 0x909   :  { %p2707_p3 = pnand %p2705_p2, %p2702_p1 }
 0x90b   :  { %2710 = shalt.err (!%p2707_p3)
}
 0x90c   :  { %2368 = dma.vmem_to_hbm [thread:$0]  %s2363_s15, 256, %s3271_s5, [#allocation4], %s2721_s1, %s2721_s1, %s2722_s17  }
 0x90d   :  { %2715 = dma.done.wait [#allocation4], 256  }
 0x90e   :  { %2716 = vsyncadd [#allocation4], 4294967040 }
 0x90f   :  { %2372 = vsyncpa [#allocation3], 1 }
 0x910   :  { %2373 = vsyncpa [#allocation6], 1 }
 0x911   :  { %2374 = vsyncpa [#allocation4], 1 }

</bundles_post_ra>
